<compile_context>
chip_gen: v7x
topology: tpu7x:2x2x1
jax: 0.10.0
libtpu: 0.0.40
codegen_flags: <defaults>
</compile_context>

<pallas_src>
import math
import functools

import jax
import jax.numpy as jnp
from jax.experimental import pallas as pl
from jax.experimental.pallas import tpu as pltpu

LN_EPS = 1e-5  # PyTorch nn.LayerNorm default

# Abramowitz & Stegun 7.1.26 erf coefficients (|err| < 1.5e-7).
_ERF_P = 0.3275911
_ERF_A1 = 0.254829592
_ERF_A2 = -0.284496736
_ERF_A3 = 1.421413741
_ERF_A4 = -1.453152027
_ERF_A5 = 1.061405429
_INV_SQRT2 = 1.0 / math.sqrt(2.0)


def _layernorm(v, gamma, beta):
    mu = jnp.mean(v, axis=-1, keepdims=True)
    d = v - mu
    var = jnp.mean(d * d, axis=-1, keepdims=True)
    return d * jax.lax.rsqrt(var + LN_EPS) * gamma + beta


def _gelu_exact(x):
    # GELU(x) = 0.5 * x * (1 + erf(x / sqrt(2))), erf via A&S 7.1.26 (exact divide).
    u = x * _INV_SQRT2
    au = jnp.abs(u)
    t = 1.0 / (1.0 + _ERF_P * au)
    poly = ((((_ERF_A5 * t + _ERF_A4) * t + _ERF_A3) * t + _ERF_A2) * t + _ERF_A1) * t
    e = poly * jnp.exp(-au * au)          # e = erfc(|u|)
    return x * jnp.where(u >= 0.0, 1.0 - 0.5 * e, 0.5 * e)


def _encoder_layer_kernel(num_heads,
                          x_ref, bias_ref, consts_ref,
                          wqkv_ref, wo_ref, w1_ref, w2_ref,
                          out_ref):
    # One grid step processes Bt batch elements.
    Bt, S, H = x_ref.shape
    NH = num_heads
    dk = H // NH
    R = Bt * S
    F = w1_ref.shape[1]
    mm_dtype = wqkv_ref.dtype            # matmul operand dtype (bf16)

    # Packed small constants: rows [ln1_g, ln1_b, bqkv(3H), bo, ln2_g, ln2_b, fb1(F), fb2]
    consts = consts_ref[...]
    ln1_g = consts[0:1, :H]
    ln1_b = consts[1:2, :H]
    bqkv = consts[2:3, :3 * H]
    bo = consts[3:4, :H]
    ln2_g = consts[4:5, :H]
    ln2_b = consts[5:6, :H]
    fb1 = consts[6:7, :F]
    fb2 = consts[7:8, :H]

    x = x_ref[...].reshape(R, H)          # leading-dim merge only (safe/cheap)

    # ---- self-attention sublayer (pre-LN) ----
    y = _layernorm(x, ln1_g, ln1_b)

    # Fused QKV projection: one wide MXU dot, bf16 operands, f32 accumulation.
    # The 1/sqrt(dk) scale is pre-folded into the Q columns of wqkv / bqkv.
    qkv = jnp.dot(y.astype(mm_dtype), wqkv_ref[...],
                  preferred_element_type=jnp.float32) + bqkv      # (R, 3H) f32
    q = qkv[:, :H].reshape(Bt, S, H)
    k = qkv[:, H:2 * H].reshape(Bt, S, H)
    v = qkv[:, 2 * H:].reshape(Bt, S, H)

    def split_heads(t):
        # (Bt, S, H) -> (Bt*NH, S, dk): static lane slices + major-dim stack,
        # then a leading-dim merge.  Batch-major, head-minor (matches attn_bias).
        heads = [t[:, :, h * dk:(h + 1) * dk] for h in range(NH)]
        return jnp.stack(heads, axis=1).reshape(Bt * NH, S, dk)

    qh = split_heads(q)
    kh = split_heads(k)
    vh = split_heads(v)

    # Batched scores + softmax over all heads at once (one exp/max/sum sequence).
    s = jnp.einsum("bqd,bkd->bqk", qh, kh,
                   preferred_element_type=jnp.float32)            # (Bt*NH, S, S)
    s = s + bias_ref[...].reshape(Bt * NH, S, S)
    s = s - jnp.max(s, axis=-1, keepdims=True)
    p = jnp.exp(s)
    p = p * pl.reciprocal(jnp.sum(p, axis=-1, keepdims=True), approx=True)
    c = jnp.einsum("bqk,bkd->bqd", p, vh,
                   preferred_element_type=jnp.float32)            # (Bt*NH, S, dk)

    # Re-gather heads head-major along lanes and do ONE fused output projection.
    c4 = c.reshape(Bt, NH, S, dk)
    ctx = jnp.concatenate([c4[:, h] for h in range(NH)], axis=-1).reshape(R, H)
    attn = jnp.dot(ctx.astype(mm_dtype), wo_ref[...],
                   preferred_element_type=jnp.float32) + bo       # (R, H)

    x1 = x + attn                          # residual (dropout = identity)

    # ---- FFN sublayer (pre-LN) ----
    y2 = _layernorm(x1, ln2_g, ln2_b)
    h1 = jnp.dot(y2.astype(mm_dtype), w1_ref[...],
                 preferred_element_type=jnp.float32) + fb1        # (R, F)
    g = _gelu_exact(h1)
    y3 = jnp.dot(g.astype(mm_dtype), w2_ref[...],
                 preferred_element_type=jnp.float32) + fb2        # (R, H)

    out_ref[...] = (x1 + y3).reshape(Bt, S, H)


def prepare_encoder_params(params, num_heads, matmul_dtype=jnp.bfloat16):
    """One-time parameter prep:
       * fold 1/sqrt(dk) into the Q projection,
       * pack Wq|Wk|Wv into one (H, 3H) matmul weight,
       * cast matmul weights to bf16 (f32 accumulation in-kernel),
       * pack all tiny bias / LayerNorm vectors into a single (8, P) f32 block."""
    H = params["wq"].shape[0]
    F = params["w1"].shape[1]
    if H % num_heads != 0:
        raise ValueError("hidden_size must be divisible by num_heads")
    dk = H // num_heads
    scale = dk ** -0.5

    wqkv = jnp.concatenate([params["wq"] * scale, params["wk"], params["wv"]], axis=1)
    bqkv = jnp.concatenate([params["bq"] * scale, params["bk"], params["bv"]], axis=1)

    P = max(3 * H, F)

    def row(vec):
        vec = jnp.asarray(vec, jnp.float32).reshape(1, -1)
        return jnp.pad(vec, ((0, 0), (0, P - vec.shape[1])))

    consts = jnp.concatenate([
        row(params["ln1_g"]), row(params["ln1_b"]),
        row(bqkv), row(params["bo"]),
        row(params["ln2_g"]), row(params["ln2_b"]),
        row(params["fb1"]), row(params["fb2"]),
    ], axis=0)                                           # (8, P) f32

    return {
        "consts": consts,
        "wqkv": wqkv.astype(matmul_dtype),               # (H, 3H)
        "wo": jnp.asarray(params["wo"]).astype(matmul_dtype),    # (H, H)
        "w1": jnp.asarray(params["w1"]).astype(matmul_dtype),    # (H, F)
        "w2": jnp.asarray(params["w2"]).astype(matmul_dtype),    # (F, H)
    }


def _device_kind():
    try:
        return jax.devices()[0].device_kind.lower()
    except Exception:
        return ""


def _tensorcores_per_device(kind=None):
    kind = _device_kind() if kind is None else kind
    # v7x / v5p / v4 expose 2 TensorCores per device (megacore); v5e/v6e 1.
    if any(t in kind for t in ("v7", "7x", "v5p", "v4")):
        return 2
    return 1


def _pick_block_batch(batch, seq, num_tensorcores=1, target_rows=256):
    """Largest per-step batch pack whose row count fits target_rows; on multi-TC
    chips keep at least one grid step per TensorCore."""
    best = 1
    for bt in range(1, batch + 1):
        if batch % bt:
            continue
        if bt > 1 and bt * seq > target_rows:
            break
        if num_tensorcores > 1 and (batch // bt) < min(num_tensorcores, batch):
            continue
        best = bt
    return best


def encoder_layer(x, attn_bias, kparams, num_heads, block_batch=None):
    B, S, H = x.shape
    NH = num_heads
    if H % NH != 0:
        raise ValueError("hidden_size must be divisible by num_heads")
    if attn_bias.shape != (B, NH, S, S):
        raise ValueError("attn_bias must be (B, num_heads, S, S)")
    F = kparams["w1"].shape[1]
    P = kparams["consts"].shape[1]

    kind = _device_kind()
    n_tc = _tensorcores_per_device(kind)
    target_rows = 128 if ("v5e" in kind or "v5 lite" in kind) else 256
    Bt = _pick_block_batch(B, S, n_tc, target_rows) if block_batch is None else block_batch
    if B % Bt != 0:
        raise ValueError("block_batch must divide the batch size")

    def const_spec(shape):
        nd = len(shape)
        idx = lambda b, _nd=nd: (0,) * _nd
        try:
            # Single-buffer the weight/const blocks (constant index across grid).
            return pl.BlockSpec(shape, idx, pipeline_mode=pl.Buffered(1))
        except Exception:
            return pl.BlockSpec(shape, idx)

    grid_spec = pltpu.PrefetchScalarGridSpec(
        num_scalar_prefetch=0,
        grid=(B // Bt,),
        in_specs=[
            pl.BlockSpec((Bt, S, H), lambda b: (b, 0, 0)),          # x
            pl.BlockSpec((Bt, NH, S, S), lambda b: (b, 0, 0, 0)),   # attn_bias
            const_spec((8, P)),                                     # packed consts
            const_spec((H, 3 * H)),                                 # Wqkv (bf16)
            const_spec((H, H)),                                     # Wo   (bf16)
            const_spec((H, F)),                                     # W1   (bf16)
            const_spec((F, H)),                                     # W2   (bf16)
        ],
        out_specs=pl.BlockSpec((Bt, S, H), lambda b: (b, 0, 0)),
    )

    # VMEM budget from actual block sizes; tighter cap on v7x (64 MiB physical).
    w_bytes = sum(int(kparams[k].size) * jnp.dtype(kparams[k].dtype).itemsize
                  for k in ("wqkv", "wo", "w1", "w2", "consts"))
    io_bytes = (2 * Bt * S * H + Bt * NH * S * S) * jnp.dtype(x.dtype).itemsize
    cap = (48 << 20) if ("v7" in kind or "7x" in kind) else (100 << 20)
    vmem_limit = int(max(32 << 20, min(4 * io_bytes + 2 * w_bytes + (24 << 20), cap)))

    kernel = functools.partial(_encoder_layer_kernel, NH)
    return pl.pallas_call(
        kernel,
        out_shape=jax.ShapeDtypeStruct((B, S, H), jnp.float32),
        grid_spec=grid_spec,
        compiler_params=pltpu.CompilerParams(
            dimension_semantics=("parallel",),
            vmem_limit_bytes=vmem_limit,
        ),
    )(
        x, attn_bias,
        kparams["consts"], kparams["wqkv"], kparams["wo"],
        kparams["w1"], kparams["w2"],
    )


def encoder_layer_ref(x, attn_bias, params, num_heads):
    """Pure-JAX f32 reference mirroring the PyTorch forward (eval mode)."""
    B, S, H = x.shape
    dk = H // num_heads
    scale = dk ** -0.5

    def ln(v, g, b):
        mu = jnp.mean(v, axis=-1, keepdims=True)
        var = jnp.mean((v - mu) ** 2, axis=-1, keepdims=True)
        return (v - mu) / jnp.sqrt(var + LN_EPS) * g + b

    y = ln(x, params["ln1_g"], params["ln1_b"])
    q = (y @ params["wq"] + params["bq"]).reshape(B, S, num_heads, dk).transpose(0, 2, 1, 3)
    k = (y @ params["wk"] + params["bk"]).reshape(B, S, num_heads, dk).transpose(0, 2, 1, 3)
    v = (y @ params["wv"] + params["bv"]).reshape(B, S, num_heads, dk).transpose(0, 2, 1, 3)
    s = jnp.einsum("bhqd,bhkd->bhqk", q * scale, k) + attn_bias
    p = jax.nn.softmax(s, axis=-1)
    o = jnp.einsum("bhqk,bhkd->bhqd", p, v).transpose(0, 2, 1, 3).reshape(B, S, H)
    o = o @ params["wo"] + params["bo"]
    x1 = x + o
    y2 = ln(x1, params["ln2_g"], params["ln2_b"])
    h1 = y2 @ params["w1"] + params["fb1"]
    g = jax.nn.gelu(h1, approximate=False)
    y3 = g @ params["w2"] + params["fb2"]
    return x1 + y3


if __name__ == "__main__":
    B, S, H, F, NH = 4, 8, 32, 64, 4

    key = jax.random.PRNGKey(0)
    keys = jax.random.split(key, 16)

    def nrm(k, shape, scale=0.1):
        return (scale * jax.random.normal(k, shape)).astype(jnp.float32)

    params = {
        "ln1_g": jnp.ones((1, H), jnp.float32),
        "ln1_b": jnp.zeros((1, H), jnp.float32),
        "wq": nrm(keys[0], (H, H)), "bq": nrm(keys[1], (1, H)),
        "wk": nrm(keys[2], (H, H)), "bk": nrm(keys[3], (1, H)),
        "wv": nrm(keys[4], (H, H)), "bv": nrm(keys[5], (1, H)),
        "wo": nrm(keys[6], (H, H)), "bo": nrm(keys[7], (1, H)),
        "ln2_g": jnp.ones((1, H), jnp.float32),
        "ln2_b": jnp.zeros((1, H), jnp.float32),
        "w1": nrm(keys[8], (H, F)), "fb1": nrm(keys[9], (1, F)),
        "w2": nrm(keys[10], (F, H)), "fb2": nrm(keys[11], (1, H)),
    }

    x = nrm(keys[12], (B, S, H), scale=1.0)
    attn_bias = nrm(keys[13], (B, NH, S, S), scale=1.0)

    kparams = prepare_encoder_params(params, NH)            # bf16 matmul weights
    out = jax.block_until_ready(encoder_layer(x, attn_bias, kparams, NH))

    ref = encoder_layer_ref(x, attn_bias, params, NH)
    # Tolerance accounts for bf16 matmul operands (f32 accumulation) and the
    # approximate EUP reciprocal on the softmax denominator, vs. an exact-f32 ref.
    if not bool(jnp.allclose(out, ref, atol=2e-2, rtol=2e-2)):
        err = float(jnp.max(jnp.abs(out - ref)))
        raise AssertionError(f"Pallas output does not match reference (max abs err {err:.3e})")

    print("KERNEL_OK")
</pallas_src>

<mosaic_0001>
module attributes {stable_mosaic.version = 11 : i64} {
  func.func @_encoder_layer_kernel(%arg0: i32, %arg1: memref<4x8x32xf32, #tpu.memory_space<vmem>>, %arg2: memref<4x4x8x8xf32, #tpu.memory_space<vmem>>, %arg3: memref<8x96xf32, #tpu.memory_space<vmem>>, %arg4: memref<32x96xbf16, #tpu.memory_space<vmem>>, %arg5: memref<32x32xbf16, #tpu.memory_space<vmem>>, %arg6: memref<32x64xbf16, #tpu.memory_space<vmem>>, %arg7: memref<64x32xbf16, #tpu.memory_space<vmem>>, %arg8: memref<4x8x32xf32, #tpu.memory_space<vmem>>) attributes {dimension_semantics = [#tpu.dimension_semantics<parallel>], iteration_bounds = array<i64: 1>, scalar_prefetch = 0 : i64, scratch_operands = 0 : i64, tpu.core_type = #tpu.core_type<tc>, window_params = [{transform_indices = @transform_0, window_bounds = array<i64: 4, 8, 32>}, {transform_indices = @transform_1, window_bounds = array<i64: 4, 4, 8, 8>}, {pipeline_mode = #tpu.pipeline_mode<synchronous>, transform_indices = @transform_2, window_bounds = array<i64: 8, 96>}, {pipeline_mode = #tpu.pipeline_mode<synchronous>, transform_indices = @transform_3, window_bounds = array<i64: 32, 96>}, {pipeline_mode = #tpu.pipeline_mode<synchronous>, transform_indices = @transform_4, window_bounds = array<i64: 32, 32>}, {pipeline_mode = #tpu.pipeline_mode<synchronous>, transform_indices = @transform_5, window_bounds = array<i64: 32, 64>}, {pipeline_mode = #tpu.pipeline_mode<synchronous>, transform_indices = @transform_6, window_bounds = array<i64: 64, 32>}, {transform_indices = @transform_7, window_bounds = array<i64: 4, 8, 32>}]} {
    %c0 = arith.constant 0 : index
    %c0_0 = arith.constant 0 : index
    %0 = vector.load %arg3[%c0, %c0_0] : memref<8x96xf32, #tpu.memory_space<vmem>>, vector<8x96xf32>
    %1 = vector.extract_strided_slice %0 {offsets = [0, 0], sizes = [1, 32], strides = [1, 1]} : vector<8x96xf32> to vector<1x32xf32>
    %2 = vector.extract_strided_slice %0 {offsets = [1, 0], sizes = [1, 32], strides = [1, 1]} : vector<8x96xf32> to vector<1x32xf32>
    %3 = vector.extract_strided_slice %0 {offsets = [2, 0], sizes = [1, 96], strides = [1, 1]} : vector<8x96xf32> to vector<1x96xf32>
    %4 = vector.extract_strided_slice %0 {offsets = [3, 0], sizes = [1, 32], strides = [1, 1]} : vector<8x96xf32> to vector<1x32xf32>
    %5 = vector.extract_strided_slice %0 {offsets = [4, 0], sizes = [1, 32], strides = [1, 1]} : vector<8x96xf32> to vector<1x32xf32>
    %6 = vector.extract_strided_slice %0 {offsets = [5, 0], sizes = [1, 32], strides = [1, 1]} : vector<8x96xf32> to vector<1x32xf32>
    %7 = vector.extract_strided_slice %0 {offsets = [6, 0], sizes = [1, 64], strides = [1, 1]} : vector<8x96xf32> to vector<1x64xf32>
    %8 = vector.extract_strided_slice %0 {offsets = [7, 0], sizes = [1, 32], strides = [1, 1]} : vector<8x96xf32> to vector<1x32xf32>
    %c0_1 = arith.constant 0 : index
    %c0_2 = arith.constant 0 : index
    %c0_3 = arith.constant 0 : index
    %9 = vector.load %arg1[%c0_1, %c0_2, %c0_3] : memref<4x8x32xf32, #tpu.memory_space<vmem>>, vector<4x8x32xf32>
    %10 = vector.shape_cast %9 : vector<4x8x32xf32> to vector<32x32xf32>
    %cst = arith.constant dense<0.000000e+00> : vector<32xf32>
    %11 = vector.multi_reduction <add>, %10, %cst [1] : vector<32x32xf32> to vector<32xf32>
    %12 = vector.shape_cast %11 : vector<32xf32> to vector<32x1xf32>
    %cst_4 = arith.constant 3.200000e+01 : f32
    %13 = vector.broadcast %cst_4 : f32 to vector<32x1xf32>
    %14 = arith.divf %12, %13 : vector<32x1xf32>
    %15 = vector.broadcast %14 : vector<32x1xf32> to vector<32x32xf32>
    %16 = arith.subf %10, %15 : vector<32x32xf32>
    %17 = arith.mulf %16, %16 : vector<32x32xf32>
    %cst_5 = arith.constant dense<0.000000e+00> : vector<32xf32>
    %18 = vector.multi_reduction <add>, %17, %cst_5 [1] : vector<32x32xf32> to vector<32xf32>
    %19 = vector.shape_cast %18 : vector<32xf32> to vector<32x1xf32>
    %cst_6 = arith.constant 3.200000e+01 : f32
    %20 = vector.broadcast %cst_6 : f32 to vector<32x1xf32>
    %21 = arith.divf %19, %20 : vector<32x1xf32>
    %cst_7 = arith.constant 9.99999974E-6 : f32
    %22 = vector.broadcast %cst_7 : f32 to vector<32x1xf32>
    %23 = arith.addf %21, %22 : vector<32x1xf32>
    %24 = math.rsqrt %23 : vector<32x1xf32>
    %25 = vector.broadcast %24 : vector<32x1xf32> to vector<32x32xf32>
    %26 = arith.mulf %16, %25 : vector<32x32xf32>
    %27 = vector.broadcast %1 : vector<1x32xf32> to vector<32x32xf32>
    %28 = arith.mulf %26, %27 : vector<32x32xf32>
    %29 = vector.broadcast %2 : vector<1x32xf32> to vector<32x32xf32>
    %30 = arith.addf %28, %29 : vector<32x32xf32>
    %31 = arith.truncf %30 : vector<32x32xf32> to vector<32x32xbf16>
    %c0_8 = arith.constant 0 : index
    %c0_9 = arith.constant 0 : index
    %32 = vector.load %arg4[%c0_8, %c0_9] : memref<32x96xbf16, #tpu.memory_space<vmem>>, vector<32x96xbf16>
    %cst_10 = arith.constant dense<0.000000e+00> : vector<32x96xf32>
    %33 = tpu.matmul %31, %32, %cst_10 {dimension_numbers = #tpu.dot_dimension_numbers<[1], [0], [0], [1], [0, 0, 1, 1], [], []>} : vector<32x32xbf16>, vector<32x96xbf16>, vector<32x96xf32> -> vector<32x96xf32>
    %34 = vector.broadcast %3 : vector<1x96xf32> to vector<32x96xf32>
    %35 = arith.addf %33, %34 : vector<32x96xf32>
    %36 = vector.extract_strided_slice %35 {offsets = [0, 0], sizes = [32, 32], strides = [1, 1]} : vector<32x96xf32> to vector<32x32xf32>
    %37 = vector.shape_cast %36 : vector<32x32xf32> to vector<4x8x32xf32>
    %38 = vector.extract_strided_slice %35 {offsets = [0, 32], sizes = [32, 32], strides = [1, 1]} : vector<32x96xf32> to vector<32x32xf32>
    %39 = vector.shape_cast %38 : vector<32x32xf32> to vector<4x8x32xf32>
    %40 = vector.extract_strided_slice %35 {offsets = [0, 64], sizes = [32, 32], strides = [1, 1]} : vector<32x96xf32> to vector<32x32xf32>
    %41 = vector.shape_cast %40 : vector<32x32xf32> to vector<4x8x32xf32>
    %42 = vector.extract_strided_slice %37 {offsets = [0, 0, 0], sizes = [4, 8, 8], strides = [1, 1, 1]} : vector<4x8x32xf32> to vector<4x8x8xf32>
    %43 = vector.extract_strided_slice %37 {offsets = [0, 0, 8], sizes = [4, 8, 8], strides = [1, 1, 1]} : vector<4x8x32xf32> to vector<4x8x8xf32>
    %44 = vector.extract_strided_slice %37 {offsets = [0, 0, 16], sizes = [4, 8, 8], strides = [1, 1, 1]} : vector<4x8x32xf32> to vector<4x8x8xf32>
    %45 = vector.extract_strided_slice %37 {offsets = [0, 0, 24], sizes = [4, 8, 8], strides = [1, 1, 1]} : vector<4x8x32xf32> to vector<4x8x8xf32>
    %46 = vector.shape_cast %42 : vector<4x8x8xf32> to vector<4x1x8x8xf32>
    %47 = vector.shape_cast %43 : vector<4x8x8xf32> to vector<4x1x8x8xf32>
    %48 = vector.shape_cast %44 : vector<4x8x8xf32> to vector<4x1x8x8xf32>
    %49 = vector.shape_cast %45 : vector<4x8x8xf32> to vector<4x1x8x8xf32>
    %50 = tpu.concatenate %46, %47, %48, %49 in 1 : vector<4x1x8x8xf32>, vector<4x1x8x8xf32>, vector<4x1x8x8xf32>, vector<4x1x8x8xf32> -> vector<4x4x8x8xf32>
    %51 = vector.shape_cast %50 : vector<4x4x8x8xf32> to vector<16x8x8xf32>
    %52 = vector.extract_strided_slice %39 {offsets = [0, 0, 0], sizes = [4, 8, 8], strides = [1, 1, 1]} : vector<4x8x32xf32> to vector<4x8x8xf32>
    %53 = vector.extract_strided_slice %39 {offsets = [0, 0, 8], sizes = [4, 8, 8], strides = [1, 1, 1]} : vector<4x8x32xf32> to vector<4x8x8xf32>
    %54 = vector.extract_strided_slice %39 {offsets = [0, 0, 16], sizes = [4, 8, 8], strides = [1, 1, 1]} : vector<4x8x32xf32> to vector<4x8x8xf32>
    %55 = vector.extract_strided_slice %39 {offsets = [0, 0, 24], sizes = [4, 8, 8], strides = [1, 1, 1]} : vector<4x8x32xf32> to vector<4x8x8xf32>
    %56 = vector.shape_cast %52 : vector<4x8x8xf32> to vector<4x1x8x8xf32>
    %57 = vector.shape_cast %53 : vector<4x8x8xf32> to vector<4x1x8x8xf32>
    %58 = vector.shape_cast %54 : vector<4x8x8xf32> to vector<4x1x8x8xf32>
    %59 = vector.shape_cast %55 : vector<4x8x8xf32> to vector<4x1x8x8xf32>
    %60 = tpu.concatenate %56, %57, %58, %59 in 1 : vector<4x1x8x8xf32>, vector<4x1x8x8xf32>, vector<4x1x8x8xf32>, vector<4x1x8x8xf32> -> vector<4x4x8x8xf32>
    %61 = vector.shape_cast %60 : vector<4x4x8x8xf32> to vector<16x8x8xf32>
    %62 = vector.extract_strided_slice %41 {offsets = [0, 0, 0], sizes = [4, 8, 8], strides = [1, 1, 1]} : vector<4x8x32xf32> to vector<4x8x8xf32>
    %63 = vector.extract_strided_slice %41 {offsets = [0, 0, 8], sizes = [4, 8, 8], strides = [1, 1, 1]} : vector<4x8x32xf32> to vector<4x8x8xf32>
    %64 = vector.extract_strided_slice %41 {offsets = [0, 0, 16], sizes = [4, 8, 8], strides = [1, 1, 1]} : vector<4x8x32xf32> to vector<4x8x8xf32>
    %65 = vector.extract_strided_slice %41 {offsets = [0, 0, 24], sizes = [4, 8, 8], strides = [1, 1, 1]} : vector<4x8x32xf32> to vector<4x8x8xf32>
    %66 = vector.shape_cast %62 : vector<4x8x8xf32> to vector<4x1x8x8xf32>
    %67 = vector.shape_cast %63 : vector<4x8x8xf32> to vector<4x1x8x8xf32>
    %68 = vector.shape_cast %64 : vector<4x8x8xf32> to vector<4x1x8x8xf32>
    %69 = vector.shape_cast %65 : vector<4x8x8xf32> to vector<4x1x8x8xf32>
    %70 = tpu.concatenate %66, %67, %68, %69 in 1 : vector<4x1x8x8xf32>, vector<4x1x8x8xf32>, vector<4x1x8x8xf32>, vector<4x1x8x8xf32> -> vector<4x4x8x8xf32>
    %71 = vector.shape_cast %70 : vector<4x4x8x8xf32> to vector<16x8x8xf32>
    "tpu.trace_start"() <{level = 10 : i32, message = "bqd,bkd->bqk"}> : () -> ()
    %cst_11 = arith.constant dense<0.000000e+00> : vector<16x8x8xf32>
    %72 = tpu.matmul %51, %61, %cst_11 {dimension_numbers = #tpu.dot_dimension_numbers<[2], [2], [1], [1], [0, 0, 0, 1, 1, 1], [0], [0]>} : vector<16x8x8xf32>, vector<16x8x8xf32>, vector<16x8x8xf32> -> vector<16x8x8xf32>
    "tpu.trace_stop"() : () -> ()
    %c0_12 = arith.constant 0 : index
    %c0_13 = arith.constant 0 : index
    %c0_14 = arith.constant 0 : index
    %c0_15 = arith.constant 0 : index
    %73 = vector.load %arg2[%c0_12, %c0_13, %c0_14, %c0_15] : memref<4x4x8x8xf32, #tpu.memory_space<vmem>>, vector<4x4x8x8xf32>
    %74 = vector.shape_cast %73 : vector<4x4x8x8xf32> to vector<16x8x8xf32>
    %75 = arith.addf %72, %74 : vector<16x8x8xf32>
    %cst_16 = arith.constant dense<0xFF800000> : vector<16x8xf32>
    %76 = vector.multi_reduction <maximumf>, %75, %cst_16 [2] : vector<16x8x8xf32> to vector<16x8xf32>
    %77 = vector.shape_cast %76 : vector<16x8xf32> to vector<16x8x1xf32>
    %78 = vector.broadcast %77 : vector<16x8x1xf32> to vector<16x8x8xf32>
    %79 = arith.subf %75, %78 : vector<16x8x8xf32>
    %80 = math.exp %79 : vector<16x8x8xf32>
    %cst_17 = arith.constant dense<0.000000e+00> : vector<16x8xf32>
    %81 = vector.multi_reduction <add>, %80, %cst_17 [2] : vector<16x8x8xf32> to vector<16x8xf32>
    %82 = vector.shape_cast %81 : vector<16x8xf32> to vector<16x8x1xf32>
    %83 = tpu.reciprocal %82 {approx = true} : vector<16x8x1xf32> -> vector<16x8x1xf32>
    %84 = vector.broadcast %83 : vector<16x8x1xf32> to vector<16x8x8xf32>
    %85 = arith.mulf %80, %84 : vector<16x8x8xf32>
    "tpu.trace_start"() <{level = 10 : i32, message = "bqk,bkd->bqd"}> : () -> ()
    %cst_18 = arith.constant dense<0.000000e+00> : vector<16x8x8xf32>
    %86 = tpu.matmul %85, %71, %cst_18 {dimension_numbers = #tpu.dot_dimension_numbers<[2], [1], [1], [2], [0, 0, 0, 1, 1, 2], [0], [0]>} : vector<16x8x8xf32>, vector<16x8x8xf32>, vector<16x8x8xf32> -> vector<16x8x8xf32>
    "tpu.trace_stop"() : () -> ()
    %87 = vector.shape_cast %86 : vector<16x8x8xf32> to vector<4x4x8x8xf32>
    %88 = vector.extract_strided_slice %87 {offsets = [0, 0, 0, 0], sizes = [4, 1, 8, 8], strides = [1, 1, 1, 1]} : vector<4x4x8x8xf32> to vector<4x1x8x8xf32>
    %89 = vector.shape_cast %88 : vector<4x1x8x8xf32> to vector<4x8x8xf32>
    %90 = vector.extract_strided_slice %87 {offsets = [0, 1, 0, 0], sizes = [4, 1, 8, 8], strides = [1, 1, 1, 1]} : vector<4x4x8x8xf32> to vector<4x1x8x8xf32>
    %91 = vector.shape_cast %90 : vector<4x1x8x8xf32> to vector<4x8x8xf32>
    %92 = vector.extract_strided_slice %87 {offsets = [0, 2, 0, 0], sizes = [4, 1, 8, 8], strides = [1, 1, 1, 1]} : vector<4x4x8x8xf32> to vector<4x1x8x8xf32>
    %93 = vector.shape_cast %92 : vector<4x1x8x8xf32> to vector<4x8x8xf32>
    %94 = vector.extract_strided_slice %87 {offsets = [0, 3, 0, 0], sizes = [4, 1, 8, 8], strides = [1, 1, 1, 1]} : vector<4x4x8x8xf32> to vector<4x1x8x8xf32>
    %95 = vector.shape_cast %94 : vector<4x1x8x8xf32> to vector<4x8x8xf32>
    %96 = tpu.concatenate %89, %91, %93, %95 in 2 : vector<4x8x8xf32>, vector<4x8x8xf32>, vector<4x8x8xf32>, vector<4x8x8xf32> -> vector<4x8x32xf32>
    %97 = vector.shape_cast %96 : vector<4x8x32xf32> to vector<32x32xf32>
    %98 = arith.truncf %97 : vector<32x32xf32> to vector<32x32xbf16>
    %c0_19 = arith.constant 0 : index
    %c0_20 = arith.constant 0 : index
    %99 = vector.load %arg5[%c0_19, %c0_20] : memref<32x32xbf16, #tpu.memory_space<vmem>>, vector<32x32xbf16>
    %cst_21 = arith.constant dense<0.000000e+00> : vector<32x32xf32>
    %100 = tpu.matmul %98, %99, %cst_21 {dimension_numbers = #tpu.dot_dimension_numbers<[1], [0], [0], [1], [0, 0, 1, 1], [], []>} : vector<32x32xbf16>, vector<32x32xbf16>, vector<32x32xf32> -> vector<32x32xf32>
    %101 = vector.broadcast %4 : vector<1x32xf32> to vector<32x32xf32>
    %102 = arith.addf %100, %101 : vector<32x32xf32>
    %103 = arith.addf %10, %102 : vector<32x32xf32>
    %cst_22 = arith.constant dense<0.000000e+00> : vector<32xf32>
    %104 = vector.multi_reduction <add>, %103, %cst_22 [1] : vector<32x32xf32> to vector<32xf32>
    %105 = vector.shape_cast %104 : vector<32xf32> to vector<32x1xf32>
    %cst_23 = arith.constant 3.200000e+01 : f32
    %106 = vector.broadcast %cst_23 : f32 to vector<32x1xf32>
    %107 = arith.divf %105, %106 : vector<32x1xf32>
    %108 = vector.broadcast %107 : vector<32x1xf32> to vector<32x32xf32>
    %109 = arith.subf %103, %108 : vector<32x32xf32>
    %110 = arith.mulf %109, %109 : vector<32x32xf32>
    %cst_24 = arith.constant dense<0.000000e+00> : vector<32xf32>
    %111 = vector.multi_reduction <add>, %110, %cst_24 [1] : vector<32x32xf32> to vector<32xf32>
    %112 = vector.shape_cast %111 : vector<32xf32> to vector<32x1xf32>
    %cst_25 = arith.constant 3.200000e+01 : f32
    %113 = vector.broadcast %cst_25 : f32 to vector<32x1xf32>
    %114 = arith.divf %112, %113 : vector<32x1xf32>
    %cst_26 = arith.constant 9.99999974E-6 : f32
    %115 = vector.broadcast %cst_26 : f32 to vector<32x1xf32>
    %116 = arith.addf %114, %115 : vector<32x1xf32>
    %117 = math.rsqrt %116 : vector<32x1xf32>
    %118 = vector.broadcast %117 : vector<32x1xf32> to vector<32x32xf32>
    %119 = arith.mulf %109, %118 : vector<32x32xf32>
    %120 = vector.broadcast %5 : vector<1x32xf32> to vector<32x32xf32>
    %121 = arith.mulf %119, %120 : vector<32x32xf32>
    %122 = vector.broadcast %6 : vector<1x32xf32> to vector<32x32xf32>
    %123 = arith.addf %121, %122 : vector<32x32xf32>
    %124 = arith.truncf %123 : vector<32x32xf32> to vector<32x32xbf16>
    %c0_27 = arith.constant 0 : index
    %c0_28 = arith.constant 0 : index
    %125 = vector.load %arg6[%c0_27, %c0_28] : memref<32x64xbf16, #tpu.memory_space<vmem>>, vector<32x64xbf16>
    %cst_29 = arith.constant dense<0.000000e+00> : vector<32x64xf32>
    %126 = tpu.matmul %124, %125, %cst_29 {dimension_numbers = #tpu.dot_dimension_numbers<[1], [0], [0], [1], [0, 0, 1, 1], [], []>} : vector<32x32xbf16>, vector<32x64xbf16>, vector<32x64xf32> -> vector<32x64xf32>
    %127 = vector.broadcast %7 : vector<1x64xf32> to vector<32x64xf32>
    %128 = arith.addf %126, %127 : vector<32x64xf32>
    %cst_30 = arith.constant 0.707106769 : f32
    %129 = vector.broadcast %cst_30 : f32 to vector<32x64xf32>
    %130 = arith.mulf %128, %129 : vector<32x64xf32>
    %131 = math.absf %130 : vector<32x64xf32>
    %cst_31 = arith.constant 0.327591091 : f32
    %132 = vector.broadcast %cst_31 : f32 to vector<32x64xf32>
    %133 = arith.mulf %132, %131 : vector<32x64xf32>
    %cst_32 = arith.constant 1.000000e+00 : f32
    %134 = vector.broadcast %cst_32 : f32 to vector<32x64xf32>
    %135 = arith.addf %134, %133 : vector<32x64xf32>
    %cst_33 = arith.constant 1.000000e+00 : f32
    %136 = vector.broadcast %cst_33 : f32 to vector<32x64xf32>
    %137 = arith.divf %136, %135 : vector<32x64xf32>
    %cst_34 = arith.constant 1.06140542 : f32
    %138 = vector.broadcast %cst_34 : f32 to vector<32x64xf32>
    %139 = arith.mulf %138, %137 : vector<32x64xf32>
    %cst_35 = arith.constant -1.45315206 : f32
    %140 = vector.broadcast %cst_35 : f32 to vector<32x64xf32>
    %141 = arith.addf %139, %140 : vector<32x64xf32>
    %142 = arith.mulf %141, %137 : vector<32x64xf32>
    %cst_36 = arith.constant 1.42141378 : f32
    %143 = vector.broadcast %cst_36 : f32 to vector<32x64xf32>
    %144 = arith.addf %142, %143 : vector<32x64xf32>
    %145 = arith.mulf %144, %137 : vector<32x64xf32>
    %cst_37 = arith.constant -0.284496725 : f32
    %146 = vector.broadcast %cst_37 : f32 to vector<32x64xf32>
    %147 = arith.addf %145, %146 : vector<32x64xf32>
    %148 = arith.mulf %147, %137 : vector<32x64xf32>
    %cst_38 = arith.constant 0.254829586 : f32
    %149 = vector.broadcast %cst_38 : f32 to vector<32x64xf32>
    %150 = arith.addf %148, %149 : vector<32x64xf32>
    %151 = arith.mulf %150, %137 : vector<32x64xf32>
    %cst_39 = arith.constant 0.000000e+00 : f32
    %152 = vector.broadcast %cst_39 : f32 to vector<32x64xf32>
    %153 = arith.subf %152, %131 : vector<32x64xf32>
    %154 = arith.mulf %153, %131 : vector<32x64xf32>
    %155 = math.exp %154 : vector<32x64xf32>
    %156 = arith.mulf %151, %155 : vector<32x64xf32>
    %cst_40 = arith.constant 0.000000e+00 : f32
    %157 = vector.broadcast %cst_40 : f32 to vector<32x64xf32>
    %158 = arith.cmpf oge, %130, %157 : vector<32x64xf32>
    %cst_41 = arith.constant 5.000000e-01 : f32
    %159 = vector.broadcast %cst_41 : f32 to vector<32x64xf32>
    %160 = arith.mulf %159, %156 : vector<32x64xf32>
    %cst_42 = arith.constant 1.000000e+00 : f32
    %161 = vector.broadcast %cst_42 : f32 to vector<32x64xf32>
    %162 = arith.subf %161, %160 : vector<32x64xf32>
    %cst_43 = arith.constant 5.000000e-01 : f32
    %163 = vector.broadcast %cst_43 : f32 to vector<32x64xf32>
    %164 = arith.mulf %163, %156 : vector<32x64xf32>
    %165 = arith.select %158, %162, %164 : vector<32x64xi1>, vector<32x64xf32>
    %166 = arith.mulf %128, %165 : vector<32x64xf32>
    %167 = arith.truncf %166 : vector<32x64xf32> to vector<32x64xbf16>
    %c0_44 = arith.constant 0 : index
    %c0_45 = arith.constant 0 : index
    %168 = vector.load %arg7[%c0_44, %c0_45] : memref<64x32xbf16, #tpu.memory_space<vmem>>, vector<64x32xbf16>
    %cst_46 = arith.constant dense<0.000000e+00> : vector<32x32xf32>
    %169 = tpu.matmul %167, %168, %cst_46 {dimension_numbers = #tpu.dot_dimension_numbers<[1], [0], [0], [1], [0, 0, 1, 1], [], []>} : vector<32x64xbf16>, vector<64x32xbf16>, vector<32x32xf32> -> vector<32x32xf32>
    %170 = vector.broadcast %8 : vector<1x32xf32> to vector<32x32xf32>
    %171 = arith.addf %169, %170 : vector<32x32xf32>
    %172 = arith.addf %103, %171 : vector<32x32xf32>
    %173 = vector.shape_cast %172 : vector<32x32xf32> to vector<4x8x32xf32>
    %c0_47 = arith.constant 0 : index
    %c0_48 = arith.constant 0 : index
    %c0_49 = arith.constant 0 : index
    %174 = vector.load %arg8[%c0_47, %c0_48, %c0_49] : memref<4x8x32xf32, #tpu.memory_space<vmem>>, vector<4x8x32xf32>
    tpu.vector_store %arg8[%c0_47, %c0_48, %c0_49], %173 {strides = array<i32>} : memref<4x8x32xf32, #tpu.memory_space<vmem>>, vector<4x8x32xf32>,
    return
  }
  func.func @transform_0(%arg0: i32) -> (i32, i32, i32) {
    %c0_i32 = arith.constant 0 : i32
    %c0_i32_0 = arith.constant 0 : i32
    %c0_i32_1 = arith.constant 0 : i32
    return %arg0, %c0_i32, %c0_i32_0 : i32, i32, i32
  }
  func.func @transform_1(%arg0: i32) -> (i32, i32, i32, i32) {
    %c0_i32 = arith.constant 0 : i32
    %c0_i32_0 = arith.constant 0 : i32
    %c0_i32_1 = arith.constant 0 : i32
    %c0_i32_2 = arith.constant 0 : i32
    return %arg0, %c0_i32, %c0_i32_0, %c0_i32_1 : i32, i32, i32, i32
  }
  func.func @transform_2(%arg0: i32) -> (i32, i32) {
    %c0_i32 = arith.constant 0 : i32
    %c0_i32_0 = arith.constant 0 : i32
    %c0_i32_1 = arith.constant 0 : i32
    return %c0_i32, %c0_i32_0 : i32, i32
  }
  func.func @transform_3(%arg0: i32) -> (i32, i32) {
    %c0_i32 = arith.constant 0 : i32
    %c0_i32_0 = arith.constant 0 : i32
    %c0_i32_1 = arith.constant 0 : i32
    return %c0_i32, %c0_i32_0 : i32, i32
  }
  func.func @transform_4(%arg0: i32) -> (i32, i32) {
    %c0_i32 = arith.constant 0 : i32
    %c0_i32_0 = arith.constant 0 : i32
    %c0_i32_1 = arith.constant 0 : i32
    return %c0_i32, %c0_i32_0 : i32, i32
  }
  func.func @transform_5(%arg0: i32) -> (i32, i32) {
    %c0_i32 = arith.constant 0 : i32
    %c0_i32_0 = arith.constant 0 : i32
    %c0_i32_1 = arith.constant 0 : i32
    return %c0_i32, %c0_i32_0 : i32, i32
  }
  func.func @transform_6(%arg0: i32) -> (i32, i32) {
    %c0_i32 = arith.constant 0 : i32
    %c0_i32_0 = arith.constant 0 : i32
    %c0_i32_1 = arith.constant 0 : i32
    return %c0_i32, %c0_i32_0 : i32, i32
  }
  func.func @transform_7(%arg0: i32) -> (i32, i32, i32) {
    %c0_i32 = arith.constant 0 : i32
    %c0_i32_0 = arith.constant 0 : i32
    %c0_i32_1 = arith.constant 0 : i32
    return %arg0, %c0_i32, %c0_i32_0 : i32, i32, i32
  }
}

</mosaic_0001>

<bundles_post_ra>
// kernel: tpu_custom_call.1
= control target key start
LH: loop header
LB: loop body
LE: loop exit
PB: predicated region body
PF: predicated region fallthrough
CT: control target
= control target key end

     0   :  { %12 = vsyncpa [#allocation3], 0  ;;  %s4739_s0 = inlined_call_operand.vmem [shape: f32[4,8,32], index: 0, kind: input, shape index: {}]   ;;  %s4740_s1 = inlined_call_operand.hbm [shape: f32[4,4,8,8], index: 1, kind: input, shape index: {}]   ;;  %s4741_s2 = inlined_call_operand.hbm [shape: f32[8,96], index: 2, kind: input, shape index: {}]   ;;  %s4742_s3 = inlined_call_operand.vmem [shape: bf16[32,96], index: 3, kind: input, shape index: {}]   ;;  %s4743_s4 = inlined_call_operand.hbm [shape: bf16[32,32], index: 4, kind: input, shape index: {}]   ;;  %s4744_s5 = inlined_call_operand.hbm [shape: bf16[32,64], index: 5, kind: input, shape index: {}]   ;;  %s4745_s6 = inlined_call_operand.vmem [shape: bf16[64,32], index: 6, kind: input, shape index: {}]   ;;  %s4746_s7 = inlined_call_operand.hbm [shape: f32[4,8,32], index: 7, kind: output, shape index: {}]  }
   0x1   :  { %13 = vsyncpa [#allocation6], 0 }
   0x2   :  { %14 = vsyncpa [#allocation9], 0 }
   0x3   :  { %15 = vsyncpa [#allocation4], 0  ;;  %s4015_s24 = smov [#allocation5]   ;;  %s4016_s26 = smov [#allocation2]  }
   0x4   :  { %s36_s25 = sshll.u32 %s4015_s24, 4  ;;  %s23_s27 = sshll.u32 %s4016_s26, 4  ;;  %s37_s25 = int_to_ptr.vmem [resolvable:$true] %s36_s25  ;;  %s4072_s27 = int_to_ptr.vmem [resolvable:$true] %s23_s27 }
   0x5   :  { %s3897_s30 = scalar_lea.hbm %s4741_s2, 128 }
   0x6   :  { %p3898_p0 = scmp.ne.s32.totalorder %s4741_s2, %s3897_s30  ;;  %p3901_p1 = scmp.lt.u32.totalorder %s3897_s30, %s4741_s2 }
   0x8   :  { %p3903_p2 = pnand %p3901_p1, %p3898_p0 }
   0xa   :  { %3906 = shalt.err (!%p3903_p2)
}
   0xb   :  { %s3907_s12 = scalar_lea.vmem %s37_s25, 128  ;;  %p3912_p4 = scmp.lt.s32.totalorder %s37_s25, %s37_s25 }
   0xc   :  { %p3908_p3 = scmp.ne.s32.totalorder %s37_s25, %s3907_s12  ;;  %p3913_p5 = scmp.lt.s32.totalorder %s3907_s12, %s3907_s12 }
   0xe   :  { %p3914_p6 = por %p3913_p5, %p3912_p4 }
  0x10   :  { %p3915_p7 = pnand %p3914_p6, %p3908_p3 }
  0x12   :  { %3918 = shalt.err (!%p3915_p7)
}
  0x13   :  { %39 = dma.hbm_to_vmem [thread:$0]  %s4741_s2, 128, %s37_s25, [#allocation6]  }
  0x14   :  { %s3919_s17 = scalar_lea.hbm %s4740_s1, 2048 }
  0x15   :  { %p3920_p8 = scmp.ne.s32.totalorder %s4740_s1, %s3919_s17  ;;  %p3923_p9 = scmp.lt.u32.totalorder %s3919_s17, %s4740_s1 }
  0x17   :  { %p3925_p10 = pnand %p3923_p9, %p3920_p8 }
  0x19   :  { %3928 = shalt.err (!%p3925_p10)
}
  0x1a   :  { %s3929_s22 = scalar_lea.vmem %s4072_s27, 2048  ;;  %p3934_p12 = scmp.lt.s32.totalorder %s4072_s27, %s4072_s27 }
  0x1b   :  { %p3930_p11 = scmp.ne.s32.totalorder %s4072_s27, %s3929_s22  ;;  %p3935_p13 = scmp.lt.s32.totalorder %s3929_s22, %s3929_s22 }
  0x1d   :  { %p3936_p0 = por %p3935_p13, %p3934_p12 }
  0x1f   :  { %p3937_p1 = pnand %p3936_p0, %p3930_p11 }
  0x21   :  { %3940 = shalt.err (!%p3937_p1)
}
  0x22   :  { %s4017_s2 = smov 128   ;;  %s4018_s23 = smov 8  }
  0x23   :  { %29 = dma.hbm_to_vmem [thread:$0]  %s4740_s1, 2048, %s4072_s27, [#allocation3], %s4017_s2, %s4017_s2, %s4018_s23  }
  0x24   :  { %s4019_s26 = smov [#allocation7]   ;;  %s3941_s8 = scalar_lea.hbm %s4743_s4, 256 }
  0x25   :  { %s47_s28 = sshll.u32 %s4019_s26, 4  ;;  %p3942_p2 = scmp.ne.s32.totalorder %s4743_s4, %s3941_s8  ;;  %s48_s28 = int_to_ptr.vmem [resolvable:$true] %s47_s28 }
  0x26   :  { %p3945_p3 = scmp.lt.u32.totalorder %s3941_s8, %s4743_s4 }
  0x28   :  { %p3947_p4 = pnand %p3945_p3, %p3942_p2 }
  0x2a   :  { %3950 = shalt.err (!%p3947_p4)
}
  0x2b   :  { %s3951_s13 = scalar_lea.vmem %s48_s28, 256  ;;  %p3956_p6 = scmp.lt.s32.totalorder %s48_s28, %s48_s28 }
  0x2c   :  { %p3952_p5 = scmp.ne.s32.totalorder %s48_s28, %s3951_s13  ;;  %p3957_p7 = scmp.lt.s32.totalorder %s3951_s13, %s3951_s13 }
  0x2e   :  { %p3958_p8 = por %p3957_p7, %p3956_p6 }
  0x30   :  { %p3959_p9 = pnand %p3958_p8, %p3952_p5 }
  0x32   :  { %3962 = shalt.err (!%p3959_p9)
}
  0x33   :  { %s4020_s1 = smov 64   ;;  %s4021_s27 = smov 4  }
  0x34   :  { %53 = dma.hbm_to_vmem [thread:$0]  %s4743_s4, 256, %s48_s28, [#allocation6], %s4020_s1, %s4020_s1, %s4021_s27  }
  0x35   :  { %s4022_s16 = smov [#allocation8]   ;;  %s3963_s20 = scalar_lea.hbm %s4744_s5, 256 }
  0x36   :  { %s59_s17 = sshll.u32 %s4022_s16, 4  ;;  %p3964_p10 = scmp.ne.s32.totalorder %s4744_s5, %s3963_s20  ;;  %s60_s17 = int_to_ptr.vmem [resolvable:$true] %s59_s17 }
  0x37   :  { %p3967_p11 = scmp.lt.u32.totalorder %s3963_s20, %s4744_s5 }
  0x39   :  { %p3969_p12 = pnand %p3967_p11, %p3964_p10 }
  0x3b   :  { %3972 = shalt.err (!%p3969_p12)
}
  0x3c   :  { %s3973_s26 = scalar_lea.vmem %s60_s17, 256  ;;  %p3978_p0 = scmp.lt.s32.totalorder %s60_s17, %s60_s17 }
  0x3d   :  { %p3974_p13 = scmp.ne.s32.totalorder %s60_s17, %s3973_s26  ;;  %p3979_p1 = scmp.lt.s32.totalorder %s3973_s26, %s3973_s26 }
  0x3f   :  { %p3980_p2 = por %p3979_p1, %p3978_p0 }
  0x41   :  { %p3981_p3 = pnand %p3980_p2, %p3974_p13 }
  0x43   :  { %3984 = shalt.err (!%p3981_p3)
}
  0x44   :  { %65 = dma.hbm_to_vmem [thread:$0]  %s4744_s5, 256, %s60_s17, [#allocation9], %s4020_s1, %s4020_s1, %s4021_s27  }
  0x45   :  { %4007 = dma.done.wait [#allocation3], 2048  }
  0x46   :  { %4008 = vsyncadd [#allocation3], 4294965248 }
  0x47   :  { %4009 = dma.done.wait [#allocation6], 384  }
  0x48   :  { %4010 = vsyncadd [#allocation6], 4294966912 }
  0x49   :  { %4011 = dma.done.wait [#allocation9], 256  }
  0x4a   :  { %4012 = vsyncadd [#allocation9], 4294967040  ;;  %vm86_vm0 = vcmask 261120   ;;  %v82_v0 = vld [vmem:[%s4739_s0] sm:$0xff]  ;;  %v84_v1 = vld [vmem:[%s4739_s0 + $0x10] sm:$0xff]  ;;  %v140_v35 = vlaneseq  ;;  %s4024_s16 = smov 120  }
  0x4b   :  { %v83_v2 = vld [vmem:[%s4739_s0 + $0x8] sm:$0xff]  ;;  %v87_v3 = vsel %vm86_vm0, %v82_v0, 0.0  ;;  %v93_v4 = vsel %vm86_vm0, %v84_v1, 0.0  ;;  %v85_v5 = vld [vmem:[%s4739_s0 + $0x18] sm:$0xff]  ;;  %v3786_v28 = vld [vmem:[%s4742_s3] sm:$0xff]   ;;  %s4025_s17 = smov 104  }
  0x4c   :  { %88 = vadd.xlane.f32.xlu0 %v87_v3  ;;  %94 = vadd.xlane.f32.xlu1 %v93_v4  ;;  %v90_v6 = vsel %vm86_vm0, %v83_v2, 0.0  ;;  %v96_v7 = vsel %vm86_vm0, %v85_v5, 0.0  ;;  %v3787_v29 = vld [vmem:[%s4742_s3 + $0x8] sm:$0xff]   ;;  %v4160_v41 = vshrl.u32 %v140_v35, 7  ;;  %v81_v45 = vld [vmem:[#allocation5] sm:$0xff]  ;;  %s4023_s3 = smov 112  }
  0x4d   :  { %3543 = vmatprep.subr.bf16.mxu0 %v3786_v28  ;;  %vm4027_vm1 = vmmov 0   ;;  %s4028_s18 = smov 96   ;;  %vm279_vm2 = vcmask 64512   ;;  %s4030_s19 = smov 24   ;;  %vm2938_vm3 = vcmask 130048   ;;  %vm2943_vm4 = vcmask 195584  }
  0x4e   :  { %3544 = vmatpush3.bf16.msra.mxu0 %v3786_v28  ;;  %v142_v44 = vsub.s32 0, %v4160_v41  ;;  %v150_v49 = vsub.s32 1, %v4160_v41  ;;  %v164_v3 = vsub.s32 2, %v4160_v41  ;;  %vm3312_vm9 = vcmask 523264  }
  0x4f   :  { %3545 = vmatprep.subr.bf16.mxu0 %v3787_v29 }
  0x50   :  { %91 = vadd.xlane.f32.xlu0 %v90_v6  ;;  %97 = vadd.xlane.f32.xlu1 %v96_v7  ;;  %v143_v48 = vrot.slane %v81_v45, %v142_v44  ;;  %v151_v54 = vrot.slane %v81_v45, %v150_v49  ;;  %v165_v4 = vrot.slane %v81_v45, %v164_v3  ;;  %v261_v45 = vld [vmem:[#allocation2] sm:$0xff] }
  0x52   :  { %3546 = vmatpush3.bf16.msra.mxu0 %v3787_v29 }
  0xd9   :  { %v89_v8 = vpop.xlane.xlu0 %88  ;;  %v95_v9 = vpop.xlane.xlu1 %94 }
  0xda   :  { %v100_v10 = vmul.f32 0.03125, %v89_v8  ;;  %v102_v11 = vmul.f32 0.03125, %v95_v9 }
  0xdc   :  { %v104_v12 = vsub.f32 %v82_v0, %v100_v10  ;;  %v106_v13 = vsub.f32 %v84_v1, %v102_v11  ;;  %v4026_v11 = vmov 0.0  }
  0xdd   :  { %v92_v14 = vpop.xlane.xlu0 %91  ;;  %v98_v15 = vpop.xlane.xlu1 %97  ;;  %3551 = vmatprep.subr.mxu0 %v4026_v11  ;;  %3556 = vmatprep.subr.mxu1 %v4026_v11 }
  0xde   :  { %v101_v16 = vmul.f32 0.03125, %v92_v14  ;;  %v103_v17 = vmul.f32 0.03125, %v98_v15  ;;  %v108_v18 = vmul.f32 %v104_v12, %v104_v12  ;;  %v110_v19 = vmul.f32 %v106_v13, %v106_v13  ;;  %3558 = vmatprep.mubr.msk.f32.mxu1 %vm4027_vm1, %v4026_v11 }
  0xe0   :  { %v105_v20 = vsub.f32 %v83_v2, %v101_v16  ;;  %v107_v21 = vsub.f32 %v85_v5, %v103_v17  ;;  %v112_v22 = vsel %vm86_vm0, %v108_v18, 0.0  ;;  %v118_v23 = vsel %vm86_vm0, %v110_v19, 0.0 }
  0xe1   :  { %113 = vadd.xlane.f32.xlu0 %v112_v22 }
  0xe2   :  { %v109_v24 = vmul.f32 %v105_v20, %v105_v20  ;;  %v111_v25 = vmul.f32 %v107_v21, %v107_v21 }
  0xe4   :  { %v115_v26 = vsel %vm86_vm0, %v109_v24, 0.0  ;;  %v121_v27 = vsel %vm86_vm0, %v111_v25, 0.0 }
  0xe5   :  { %119 = vadd.xlane.f32.xlu0 %v118_v23  ;;  %116 = vadd.xlane.f32.xlu1 %v115_v26 }
  0xe9   :  { %122 = vadd.xlane.f32.xlu1 %v121_v27 }
 0x16e   :  { %v114_v30 = vpop.xlane.xlu0 %113 }
 0x16f   :  { %v124_v31 = vmul.f32 0.03125, %v114_v30 }
 0x171   :  { %v128_v32 = vadd.f32 1e-05, %v124_v31 }
 0x172   :  { %v117_v33 = vpop.xlane.xlu1 %116  ;;  %v120_v34 = vpop.xlane.xlu0 %119 }
 0x173   :  { %3796 = vrsqrt.f32 %v128_v32  ;;  %v125_v36 = vmul.f32 0.03125, %v117_v33  ;;  %v126_v37 = vmul.f32 0.03125, %v120_v34 }
 0x175   :  { %v129_v38 = vadd.f32 1e-05, %v125_v36  ;;  %v130_v39 = vadd.f32 1e-05, %v126_v37 }
 0x176   :  { %v123_v40 = vpop.xlane.xlu1 %122 }
 0x177   :  { %3798 = vrsqrt.f32 %v129_v38  ;;  %v127_v42 = vmul.f32 0.03125, %v123_v40 }
 0x178   :  { %3800 = vrsqrt.f32 %v130_v39 }
 0x179   :  { %v131_v43 = vadd.f32 1e-05, %v127_v42 }
 0x17b   :  { %3802 = vrsqrt.f32 %v131_v43 }
 0x17d   :  { %v3797_v46 = vpop.eup %3796 }
 0x17e   :  { %v136_v47 = vmul.f32 %v3797_v46, %v104_v12 }
 0x180   :  { %v144_v53 = vmul.f32 %v143_v48, %v136_v47 }
 0x181   :  { %v3799_v50 = vpop.eup %3798 }
 0x182   :  { %v3801_v51 = vpop.eup %3800  ;;  %v137_v52 = vmul.f32 %v3799_v50, %v105_v20  ;;  %v152_v59 = vadd.f32 %v151_v54, %v144_v53  ;;  %v262_v50 = vld [vmem:[#allocation2 + $0x8] sm:$0xff] }
 0x183   :  { %v138_v55 = vmul.f32 %v3801_v51, %v106_v13 }
 0x184   :  { %v145_v56 = vmul.f32 %v143_v48, %v137_v52 }
 0x185   :  { %v3803_v57 = vpop.eup %3802  ;;  %v146_v61 = vmul.f32 %v143_v48, %v138_v55 }
 0x186   :  { %v139_v58 = vmul.f32 %v3803_v57, %v107_v21  ;;  %v153_v60 = vadd.f32 %v151_v54, %v145_v56  ;;  %v263_v56 = vld [vmem:[#allocation2 + $0x10] sm:$0xff] }
 0x187   :  { %v154_v0 = vadd.f32 %v151_v54, %v146_v61 }
 0x188   :  { %v156_v62 = vpack.c.bf16 %v153_v60, %v152_v59  ;;  %v147_v63 = vmul.f32 %v143_v48, %v139_v58 }
 0x18a   :  { %3547 = vmatprep.mubr.msk.bf16.mxu0 %vm86_vm0, %v156_v62  ;;  %v155_v1 = vadd.f32 %v151_v54, %v147_v63  ;;  %v264_v54 = vld [vmem:[#allocation2 + $0x18] sm:$0xff]  ;;  %v266_v62 = vld [vmem:[#allocation2 + $0x28] sm:$0xff] }
 0x18c   :  { %v157_v2 = vpack.c.bf16 %v155_v1, %v154_v0  ;;  %v265_v1 = vld [vmem:[#allocation2 + $0x20] sm:$0xff] }
 0x18e   :  { %3548 = vmatmul.mubr.msk.bf16.vlgmr.msra.gmra.mrb[0].mxu0 %vm86_vm0, %v157_v2 }
 0x18f   :  { %3553 = vmatprep.mubr.msk.f32.mxu0 %vm4027_vm1, %v4026_v11 }
 0x261   :  { %v3549_v5 = vpop.f32.mrb[0].mxu0 }
 0x262   :  { %v218_v6 = vpop.f32.mrb[1].mxu0  ;;  %v4172_v12 = vadd.f32 %v3549_v5, %v165_v4 }
 0x263   :  { %v219_v7 = vadd.f32 %v218_v6, %v165_v4  ;;  %v3550_v8 = vpop.f32.mrb[2].mxu0 }
 0x264   :  { %v221_v9 = vpop.f32.mrb[3].mxu0  ;;  %v4182_v13 = vadd.f32 %v3550_v8, %v165_v4 }
 0x265   :  { %245 = vrot.lane.b32.xlu1 %v219_v7, %s4023_s3  ;;  %237 = vrot.lane.b32.xlu0 %v219_v7, %s4024_s16  ;;  %v4167_v10 = vadd.f32 %v221_v9, %v165_v4 }
 0x269   :  { %253 = vrot.lane.b32.xlu1 %v219_v7, %s4025_s17  ;;  %247 = vrot.lane.b32.xlu0 %v4167_v10, %s4023_s3 }
 0x26d   :  { %239 = vrot.lane.b32.xlu1 %v4167_v10, %s4024_s16  ;;  %241 = vrot.lane.b32.xlu0 %v4172_v12, %s4024_s16 }
 0x271   :  { %255 = vrot.lane.b32.xlu1 %v4167_v10, %s4025_s17  ;;  %257 = vrot.lane.b32.xlu0 %v4172_v12, %s4025_s17 }
 0x275   :  { %249 = vrot.lane.b32.xlu1 %v4172_v12, %s4023_s3  ;;  %251 = vrot.lane.b32.xlu0 %v4182_v13, %s4023_s3 }
 0x279   :  { %243 = vrot.lane.b32.xlu1 %v4182_v13, %s4024_s16  ;;  %277 = vrot.lane.b32.xlu0 %v219_v7, %s4028_s18 }
 0x27d   :  { %259 = vrot.lane.b32.xlu1 %v4182_v13, %s4025_s17 }
 0x2d7   :  { %v246_v14 = vpop.permute.xlu1 %245  ;;  %v238_v15 = vpop.permute.xlu0 %237 }
 0x2d8   :  { %430 = vrot.lane.b32.xlu0 %v246_v14, %s4028_s18  ;;  %354 = vrot.lane.b32.xlu1 %v238_v15, %s4028_s18 }
 0x2db   :  { %v254_v16 = vpop.permute.xlu1 %253  ;;  %v4191_v17 = vpop.permute.xlu0 %247 }
 0x2dc   :  { %582 = vrot.lane.b32.xlu0 %v4167_v10, %s4028_s18  ;;  %506 = vrot.lane.b32.xlu1 %v254_v16, %s4028_s18 }
 0x2df   :  { %v240_v18 = vpop.permute.xlu1 %239  ;;  %v4196_v19 = vpop.permute.xlu0 %241 }
 0x2e0   :  { %658 = vrot.lane.b32.xlu1 %v240_v18, %s4028_s18  ;;  %734 = vrot.lane.b32.xlu0 %v4191_v17, %s4028_s18 }
 0x2e3   :  { %v4201_v20 = vpop.permute.xlu1 %255  ;;  %v4203_v21 = vpop.permute.xlu0 %257 }
 0x2e4   :  { %810 = vrot.lane.b32.xlu1 %v4201_v20, %s4028_s18  ;;  %886 = vrot.lane.b32.xlu0 %v4172_v12, %s4028_s18 }
 0x2e7   :  { %v4209_v22 = vpop.permute.xlu1 %249  ;;  %v4211_v23 = vpop.permute.xlu0 %251 }
 0x2e8   :  { %1038 = vrot.lane.b32.xlu0 %v4209_v22, %s4028_s18  ;;  %962 = vrot.lane.b32.xlu1 %v4196_v19, %s4028_s18 }
 0x2eb   :  { %v278_v24 = vpop.permute.xlu0 %277  ;;  %v4221_v25 = vpop.permute.xlu1 %243 }
 0x2ec   :  { %1190 = vrot.lane.b32.xlu0 %v4182_v13, %s4028_s18  ;;  %1114 = vrot.lane.b32.xlu1 %v4203_v21, %s4028_s18 }
 0x2ed   :  { %3552 = vmatpush3.xpose.msk.msra.mxu0 %vm279_vm2, %v278_v24 }
 0x2ee   :  { %3566 = vmatprep.subr.mxu0 %v4026_v11 }
 0x2ef   :  { %v4232_v26 = vpop.permute.xlu1 %259 }
 0x2f0   :  { %3554 = vmatmul.mubr.msk.f32.vlgmr.msra.gmra.mrb[4].mxu0 %vm279_vm2, %v219_v7  ;;  %1266 = vrot.lane.b32.xlu1 %v4221_v25, %s4028_s18 }
 0x2f1   :  { %1342 = vrot.lane.b32.xlu0 %v4211_v23, %s4028_s18  ;;  %3568 = vmatprep.mubr.msk.f32.mxu0 %vm4027_vm1, %v4026_v11 }
 0x2f4   :  { %1418 = vrot.lane.b32.xlu1 %v4232_v26, %s4028_s18 }
 0x2f5   :  { %1670 = vrot.lane.b32.xlu0 %v219_v7, %s4020_s1  ;;  %v268_v7 = vld [vmem:[#allocation2 + $0x38] sm:$0xff] }
 0x2f8   :  { %1746 = vrot.lane.b32.xlu1 %v238_v15, %s4020_s1 }
 0x2f9   :  { %1822 = vrot.lane.b32.xlu0 %v246_v14, %s4020_s1 }
 0x2fc   :  { %1898 = vrot.lane.b32.xlu1 %v254_v16, %s4020_s1 }
 0x2fd   :  { %2278 = vrot.lane.b32.xlu0 %v4172_v12, %s4020_s1 }
 0x300   :  { %1974 = vrot.lane.b32.xlu1 %v4167_v10, %s4020_s1 }
 0x301   :  { %2126 = vrot.lane.b32.xlu0 %v4191_v17, %s4020_s1 }
 0x304   :  { %2354 = vrot.lane.b32.xlu1 %v4196_v19, %s4020_s1 }
 0x308   :  { %2050 = vrot.lane.b32.xlu1 %v240_v18, %s4020_s1 }
 0x30c   :  { %2202 = vrot.lane.b32.xlu1 %v4201_v20, %s4020_s1 }
 0x34a   :  { %v355_v27 = vpop.permute.xlu1 %354  ;;  %v431_v28 = vpop.permute.xlu0 %430 }
 0x34b   :  { %3557 = vmatpush3.xpose.msk.msra.mxu1 %vm279_vm2, %v355_v27 }
 0x34c   :  { %3561 = vmatprep.subr.mxu1 %v4026_v11 }
 0x34e   :  { %3559 = vmatmul.mubr.msk.f32.vlgmr.msra.gmra.mrb[0].mxu1 %vm279_vm2, %v238_v15  ;;  %v507_v29 = vpop.permute.xlu1 %506  ;;  %v583_v30 = vpop.permute.xlu0 %582 }
 0x34f   :  { %3562 = vmatpush3.xpose.msk.msra.mxu1 %vm279_vm2, %v431_v28  ;;  %3567 = vmatpush3.xpose.msk.msra.mxu0 %vm279_vm2, %v507_v29  ;;  %v269_v29 = vld [vmem:[#allocation2 + $0x40] sm:$0xff] }
 0x350   :  { %3563 = vmatprep.mubr.msk.f32.mxu1 %vm4027_vm1, %v4026_v11  ;;  %3571 = vmatprep.subr.mxu1 %v4026_v11 }
 0x351   :  { %3576 = vmatprep.subr.mxu0 %v4026_v11 }
 0x352   :  { %v659_v31 = vpop.permute.xlu1 %658  ;;  %3564 = vmatmul.mubr.msk.f32.vlgmr.msra.gmra.mrb[2].mxu1 %vm279_vm2, %v246_v14  ;;  %3569 = vmatmul.mubr.msk.f32.vlgmr.msra.gmra.mrb[6].mxu0 %vm279_vm2, %v254_v16  ;;  %v735_v32 = vpop.permute.xlu0 %734  ;;  %v267_v14 = vld [vmem:[#allocation2 + $0x30] sm:$0xff] }
 0x353   :  { %3572 = vmatpush3.xpose.msk.msra.mxu1 %vm279_vm2, %v583_v30  ;;  %3577 = vmatpush3.xpose.msk.msra.mxu0 %vm279_vm2, %v659_v31 }
 0x354   :  { %3573 = vmatprep.mubr.msk.f32.mxu1 %vm4027_vm1, %v4026_v11  ;;  %3578 = vmatprep.mubr.msk.f32.mxu0 %vm4027_vm1, %v4026_v11 }
 0x355   :  { %3581 = vmatprep.subr.mxu1 %v4026_v11  ;;  %3586 = vmatprep.subr.mxu0 %v4026_v11 }
 0x356   :  { %v811_v33 = vpop.permute.xlu1 %810  ;;  %3574 = vmatmul.mubr.msk.f32.vlgmr.msra.gmra.mrb[4].mxu1 %vm279_vm2, %v4167_v10  ;;  %3579 = vmatmul.mubr.msk.f32.vlgmr.msra.gmra.mrb[8].mxu0 %vm279_vm2, %v240_v18  ;;  %v887_v34 = vpop.permute.xlu0 %886 }
 0x357   :  { %3582 = vmatpush3.xpose.msk.msra.mxu1 %vm279_vm2, %v735_v32  ;;  %3587 = vmatpush3.xpose.msk.msra.mxu0 %vm279_vm2, %v811_v33 }
 0x358   :  { %3583 = vmatprep.mubr.msk.f32.mxu1 %vm4027_vm1, %v4026_v11  ;;  %3588 = vmatprep.mubr.msk.f32.mxu0 %vm4027_vm1, %v4026_v11 }
 0x359   :  { %3591 = vmatprep.subr.mxu1 %v4026_v11  ;;  %3596 = vmatprep.subr.mxu0 %v4026_v11 }
 0x35a   :  { %v963_v35 = vpop.permute.xlu1 %962  ;;  %3584 = vmatmul.mubr.msk.f32.vlgmr.msra.gmra.mrb[6].mxu1 %vm279_vm2, %v4191_v17  ;;  %3589 = vmatmul.mubr.msk.f32.vlgmr.msra.gmra.mrb[10].mxu0 %vm279_vm2, %v4201_v20  ;;  %v1039_v36 = vpop.permute.xlu0 %1038 }
 0x35b   :  { %3592 = vmatpush3.xpose.msk.msra.mxu1 %vm279_vm2, %v887_v34  ;;  %3597 = vmatpush3.xpose.msk.msra.mxu0 %vm279_vm2, %v963_v35  ;;  %v272_v34 = vld [vmem:[#allocation2 + $0x58] sm:$0xff] }
 0x35c   :  { %3593 = vmatprep.mubr.msk.f32.mxu1 %vm4027_vm1, %v4026_v11  ;;  %3598 = vmatprep.mubr.msk.f32.mxu0 %vm4027_vm1, %v4026_v11 }
 0x35d   :  { %3601 = vmatprep.subr.mxu1 %v4026_v11  ;;  %3606 = vmatprep.subr.mxu0 %v4026_v11 }
 0x35e   :  { %v1115_v37 = vpop.permute.xlu1 %1114  ;;  %3594 = vmatmul.mubr.msk.f32.vlgmr.msra.gmra.mrb[8].mxu1 %vm279_vm2, %v4172_v12  ;;  %3599 = vmatmul.mubr.msk.f32.vlgmr.msra.gmra.mrb[12].mxu0 %vm279_vm2, %v4196_v19  ;;  %v1191_v38 = vpop.permute.xlu0 %1190  ;;  %v270_v19 = vld [vmem:[#allocation2 + $0x48] sm:$0xff] }
 0x35f   :  { %3602 = vmatpush3.xpose.msk.msra.mxu1 %vm279_vm2, %v1039_v36  ;;  %3607 = vmatpush3.xpose.msk.msra.mxu0 %vm279_vm2, %v1115_v37 }
 0x360   :  { %3603 = vmatprep.mubr.msk.f32.mxu1 %vm4027_vm1, %v4026_v11  ;;  %3608 = vmatprep.mubr.msk.f32.mxu0 %vm4027_vm1, %v4026_v11 }
 0x361   :  { %3611 = vmatprep.subr.mxu1 %v4026_v11  ;;  %3616 = vmatprep.subr.mxu0 %v4026_v11 }
 0x362   :  { %v1267_v39 = vpop.permute.xlu1 %1266  ;;  %3604 = vmatmul.mubr.msk.f32.vlgmr.msra.gmra.mrb[10].mxu1 %vm279_vm2, %v4209_v22  ;;  %3609 = vmatmul.mubr.msk.f32.vlgmr.msra.gmra.mrb[14].mxu0 %vm279_vm2, %v4203_v21 }
 0x363   :  { %3612 = vmatpush3.xpose.msk.msra.mxu1 %vm279_vm2, %v1191_v38  ;;  %3617 = vmatpush3.xpose.msk.msra.mxu0 %vm279_vm2, %v1267_v39  ;;  %v1343_v40 = vpop.permute.xlu0 %1342  ;;  %v271_v39 = vld [vmem:[#allocation2 + $0x50] sm:$0xff] }
 0x364   :  { %3613 = vmatprep.mubr.msk.f32.mxu1 %vm4027_vm1, %v4026_v11  ;;  %3618 = vmatprep.mubr.msk.f32.mxu0 %vm4027_vm1, %v4026_v11 }
 0x365   :  { %3621 = vmatprep.subr.mxu1 %v4026_v11  ;;  %3626 = vmatprep.subr.mxu0 %v4026_v11 }
 0x366   :  { %v1419_v42 = vpop.permute.xlu1 %1418  ;;  %3614 = vmatmul.mubr.msk.f32.vlgmr.msra.gmra.mrb[12].mxu1 %vm279_vm2, %v4182_v13  ;;  %3619 = vmatmul.mubr.msk.f32.vlgmr.msra.gmra.mrb[16].mxu0 %vm279_vm2, %v4221_v25 }
 0x367   :  { %3622 = vmatpush3.xpose.msk.msra.mxu1 %vm279_vm2, %v1343_v40  ;;  %3627 = vmatpush3.xpose.msk.msra.mxu0 %vm279_vm2, %v1419_v42  ;;  %v1671_v43 = vpop.permute.xlu0 %1670 }
 0x368   :  { %3623 = vmatprep.mubr.msk.f32.mxu1 %vm4027_vm1, %v4026_v11  ;;  %3628 = vmatprep.mubr.msk.f32.mxu0 %vm4027_vm1, %v4026_v11 }
 0x369   :  { %3631 = vmatprep.subr.mxu1 %v4026_v11  ;;  %3636 = vmatprep.subr.mxu0 %v4026_v11 }
 0x36a   :  { %v1747_v44 = vpop.permute.xlu1 %1746  ;;  %3624 = vmatmul.mubr.msk.f32.vlgmr.msra.gmra.mrb[14].mxu1 %vm279_vm2, %v4211_v23  ;;  %3629 = vmatmul.mubr.msk.f32.vlgmr.msra.gmra.mrb[18].mxu0 %vm279_vm2, %v4232_v26 }
 0x36b   :  { %3632 = vmatpush3.msra.mxu1 %v1671_v43  ;;  %3637 = vmatpush3.msra.mxu0 %v1747_v44 }
 0x36c   :  { %3633 = vmatprep.mubr.msk.f32.mxu1 %vm4027_vm1, %v4026_v11  ;;  %3641 = vmatprep.subr.mxu1 %v4026_v11 }
 0x36d   :  { %3638 = vmatprep.mubr.msk.f32.mxu0 %vm4027_vm1, %v4026_v11  ;;  %3646 = vmatprep.subr.mxu0 %v4026_v11 }
 0x3c3   :  { %v350_v46 = vpop.f32.mrb[4].mxu0 }
 0x3c4   :  { %v4339_v47 = vadd.f32 %v350_v46, %v261_v45  ;;  %v3555_v48 = vpop.f32.mrb[5].mxu0  ;;  %v274_v45 = vld [vmem:[#allocation2 + $0x68] sm:$0xff] }
 0x3c6   :  { %v1494_v49 = vsel %vm279_vm2, %v4339_v47, -inf }
 0x3c7   :  { %1495 = vmax.xlane.f32.xlu0 %v1494_v49 }
 0x421   :  { %v426_v51 = vpop.f32.mrb[0].mxu1 }
 0x422   :  { %v4343_v52 = vadd.f32 %v426_v51, %v262_v50  ;;  %v3560_v53 = vpop.f32.mrb[1].mxu1  ;;  %v273_v51 = vld [vmem:[#allocation2 + $0x60] sm:$0xff] }
 0x424   :  { %v1497_v55 = vsel %vm279_vm2, %v4343_v52, -inf }
 0x425   :  { %1498 = vmax.xlane.f32.xlu1 %v1497_v55  ;;  %v502_v57 = vpop.f32.mrb[2].mxu1  ;;  %v578_v58 = vpop.f32.mrb[6].mxu0 }
 0x426   :  { %v4347_v59 = vadd.f32 %v578_v58, %v264_v54  ;;  %v3565_v60 = vpop.f32.mrb[3].mxu1  ;;  %v3570_v61 = vpop.f32.mrb[7].mxu0  ;;  %v4349_v63 = vadd.f32 %v502_v57, %v263_v56  ;;  %v276_v57 = vld [vmem:[#allocation2 + $0x78] sm:$0xff] }
 0x428   :  { %v1503_v0 = vsel %vm279_vm2, %v4347_v59, -inf  ;;  %v1500_v10 = vsel %vm279_vm2, %v4349_v63, -inf }
 0x429   :  { %1504 = vmax.xlane.f32.xlu0 %v1503_v0  ;;  %v654_v2 = vpop.f32.mrb[4].mxu1  ;;  %v730_v3 = vpop.f32.mrb[8].mxu0  ;;  %v275_v0 = vld [vmem:[#allocation2 + $0x70] sm:$0xff] }
 0x42a   :  { %v4353_v4 = vadd.f32 %v730_v3, %v266_v62  ;;  %v3575_v5 = vpop.f32.mrb[5].mxu1  ;;  %v3580_v6 = vpop.f32.mrb[9].mxu0  ;;  %v4355_v8 = vadd.f32 %v654_v2, %v265_v1 }
 0x42c   :  { %v1509_v9 = vsel %vm279_vm2, %v4353_v4, -inf  ;;  %v1506_v27 = vsel %vm279_vm2, %v4355_v8, -inf }
 0x42d   :  { %1510 = vmax.xlane.f32.xlu1 %v1509_v9  ;;  %v882_v12 = vpop.f32.mrb[10].mxu0  ;;  %1501 = vmax.xlane.f32.xlu0 %v1500_v10  ;;  %v806_v15 = vpop.f32.mrb[6].mxu1 }
 0x42e   :  { %v4361_v16 = vadd.f32 %v882_v12, %v268_v7  ;;  %v3585_v17 = vpop.f32.mrb[7].mxu1  ;;  %v3590_v18 = vpop.f32.mrb[11].mxu0  ;;  %v4363_v20 = vadd.f32 %v806_v15, %v267_v14 }
 0x42f   :  { %v4405_v12 = vpop.permute.xlu0 %1822 }
 0x430   :  { %v1515_v24 = vsel %vm279_vm2, %v4361_v16, -inf  ;;  %v1512_v37 = vsel %vm279_vm2, %v4363_v20, -inf }
 0x431   :  { %1516 = vmax.xlane.f32.xlu1 %v1515_v24  ;;  %v1034_v28 = vpop.f32.mrb[12].mxu0  ;;  %1507 = vmax.xlane.f32.xlu0 %v1506_v27  ;;  %v958_v30 = vpop.f32.mrb[8].mxu1 }
 0x432   :  { %v4369_v31 = vadd.f32 %v1034_v28, %v270_v19  ;;  %v3595_v32 = vpop.f32.mrb[9].mxu1  ;;  %v3600_v33 = vpop.f32.mrb[13].mxu0  ;;  %v4371_v35 = vadd.f32 %v958_v30, %v269_v29 }
 0x433   :  { %v4409_v14 = vpop.permute.xlu0 %2278  ;;  %v4422_v24 = vpop.permute.xlu1 %1898 }
 0x434   :  { %v1521_v36 = vsel %vm279_vm2, %v4369_v31, -inf  ;;  %v1518_v49 = vsel %vm279_vm2, %v4371_v35, -inf }
 0x435   :  { %1522 = vmax.xlane.f32.xlu1 %v1521_v36  ;;  %v1186_v38 = vpop.f32.mrb[14].mxu0  ;;  %1513 = vmax.xlane.f32.xlu0 %v1512_v37  ;;  %v1110_v40 = vpop.f32.mrb[10].mxu1 }
 0x436   :  { %v4377_v42 = vadd.f32 %v1186_v38, %v272_v34  ;;  %v3605_v43 = vpop.f32.mrb[11].mxu1  ;;  %v3610_v44 = vpop.f32.mrb[15].mxu0  ;;  %v4379_v46 = vadd.f32 %v1110_v40, %v271_v39 }
 0x437   :  { %v4415_v15 = vpop.permute.xlu0 %2126  ;;  %v4424_v27 = vpop.permute.xlu1 %1974 }
 0x438   :  { %v1527_v48 = vsel %vm279_vm2, %v4377_v42, -inf  ;;  %v1524_v61 = vsel %vm279_vm2, %v4379_v46, -inf }
 0x439   :  { %1528 = vmax.xlane.f32.xlu1 %v1527_v48  ;;  %v1338_v50 = vpop.f32.mrb[16].mxu0  ;;  %1519 = vmax.xlane.f32.xlu0 %v1518_v49  ;;  %v1262_v53 = vpop.f32.mrb[12].mxu1 }
 0x43a   :  { %v4385_v54 = vadd.f32 %v1338_v50, %v274_v45  ;;  %v3615_v55 = vpop.f32.mrb[13].mxu1  ;;  %v3620_v56 = vpop.f32.mrb[17].mxu0  ;;  %v4387_v58 = vadd.f32 %v1262_v53, %v273_v51 }
 0x43c   :  { %v1533_v60 = vsel %vm279_vm2, %v4385_v54, -inf  ;;  %v1530_v9 = vsel %vm279_vm2, %v4387_v58, -inf }
 0x43d   :  { %1534 = vmax.xlane.f32.xlu1 %v1533_v60  ;;  %v1490_v62 = vpop.f32.mrb[18].mxu0  ;;  %1525 = vmax.xlane.f32.xlu0 %v1524_v61  ;;  %v1414_v1 = vpop.f32.mrb[14].mxu1 }
 0x43e   :  { %v4393_v2 = vadd.f32 %v1490_v62, %v276_v57  ;;  %v3625_v3 = vpop.f32.mrb[15].mxu1  ;;  %v3630_v5 = vpop.f32.mrb[19].mxu0  ;;  %v4395_v6 = vadd.f32 %v1414_v1, %v275_v0 }
 0x440   :  { %v1539_v7 = vsel %vm279_vm2, %v4393_v2, -inf  ;;  %v1536_v10 = vsel %vm279_vm2, %v4395_v6, -inf }
 0x441   :  { %1540 = vmax.xlane.f32.xlu1 %v1539_v7  ;;  %1531 = vmax.xlane.f32.xlu0 %v1530_v9 }
 0x445   :  { %1537 = vmax.xlane.f32.xlu0 %v1536_v10 }
 0x452   :  { %2506 = vrot.lane.b32.xlu1 %v4203_v21, %s4020_s1 }
 0x454   :  { %v1496_v17 = vpop.xlane.xlu0 %1495 }
 0x455   :  { %v1542_v18 = vsub.f32 %v4339_v47, %v1496_v17 }
 0x456   :  { %2658 = vrot.lane.b32.xlu1 %v4221_v25, %s4020_s1 }
 0x457   :  { %v1558_v19 = vmul.f32 1.442695, %v1542_v18 }
 0x459   :  { %3804 = vpow2.f32 %v1558_v19 }
 0x45b   :  { %2430 = vrot.lane.b32.xlu0 %v4209_v22, %s4020_s1  ;;  %v4426_v22 = vpop.permute.xlu1 %2354 }
 0x45f   :  { %2582 = vrot.lane.b32.xlu0 %v4182_v13, %s4020_s1  ;;  %v4428_v13 = vpop.permute.xlu1 %2050 }
 0x463   :  { %v4418_v21 = vpop.eup %3804  ;;  %v4430_v28 = vpop.permute.xlu1 %2202 }
 0x464   :  { %v1590_v25 = vsel %vm279_vm2, %v4418_v21, 0.0 }
 0x47e   :  { %1591 = vadd.xlane.f32.xlu0 %v1590_v25 }
 0x4b2   :  { %v1499_v29 = vpop.xlane.xlu1 %1498 }
 0x4b3   :  { %v1543_v47 = vsub.f32 %v4343_v52, %v1499_v29 }
 0x4b5   :  { %v1560_v30 = vmul.f32 1.442695, %v1543_v47 }
 0x4b6   :  { %v1505_v32 = vpop.xlane.xlu0 %1504 }
 0x4b7   :  { %3806 = vpow2.f32 %v1560_v30  ;;  %v1545_v33 = vsub.f32 %v4347_v59, %v1505_v32 }
 0x4b9   :  { %v1564_v34 = vmul.f32 1.442695, %v1545_v33 }
 0x4ba   :  { %v1511_v36 = vpop.xlane.xlu1 %1510  ;;  %v1502_v37 = vpop.xlane.xlu0 %1501 }
 0x4bb   :  { %3808 = vpow2.f32 %v1564_v34  ;;  %v1547_v38 = vsub.f32 %v4353_v4, %v1511_v36  ;;  %v1544_v39 = vsub.f32 %v4349_v63, %v1502_v37 }
 0x4bd   :  { %v1568_v40 = vmul.f32 1.442695, %v1547_v38  ;;  %v1562_v43 = vmul.f32 1.442695, %v1544_v39 }
 0x4be   :  { %v1517_v44 = vpop.xlane.xlu1 %1516  ;;  %v1508_v45 = vpop.xlane.xlu0 %1507 }
 0x4bf   :  { %3810 = vpow2.f32 %v1568_v40  ;;  %v1549_v52 = vsub.f32 %v4361_v16, %v1517_v44  ;;  %v1546_v48 = vsub.f32 %v4355_v8, %v1508_v45 }
 0x4c0   :  { %3812 = vpow2.f32 %v1562_v43 }
 0x4c1   :  { %v4438_v49 = vpop.eup %3806  ;;  %v1572_v59 = vmul.f32 1.442695, %v1549_v52  ;;  %v1566_v50 = vmul.f32 1.442695, %v1546_v48 }
 0x4c2   :  { %v1523_v51 = vpop.xlane.xlu1 %1522  ;;  %v1514_v53 = vpop.xlane.xlu0 %1513  ;;  %v1593_v4 = vsel %vm279_vm2, %v4438_v49, 0.0 }
 0x4c3   :  { %3814 = vpow2.f32 %v1572_v59  ;;  %v1551_v63 = vsub.f32 %v4369_v31, %v1523_v51  ;;  %v1548_v55 = vsub.f32 %v4363_v20, %v1514_v53  ;;  %1594 = vadd.xlane.f32.xlu1 %v1593_v4 }
 0x4c4   :  { %3816 = vpow2.f32 %v1566_v50 }
 0x4c5   :  { %v4444_v16 = vpop.eup %3808  ;;  %v1576_v8 = vmul.f32 1.442695, %v1551_v63  ;;  %v1570_v56 = vmul.f32 1.442695, %v1548_v55 }
 0x4c6   :  { %v1529_v57 = vpop.xlane.xlu1 %1528  ;;  %v1520_v60 = vpop.xlane.xlu0 %1519  ;;  %v1599_v61 = vsel %vm279_vm2, %v4444_v16, 0.0 }
 0x4c7   :  { %3818 = vpow2.f32 %v1576_v8  ;;  %v1553_v62 = vsub.f32 %v4377_v42, %v1529_v57  ;;  %v1550_v0 = vsub.f32 %v4371_v35, %v1520_v60  ;;  %1600 = vadd.xlane.f32.xlu1 %v1599_v61 }
 0x4c8   :  { %3820 = vpow2.f32 %v1570_v56 }
 0x4c9   :  { %v4450_v31 = vpop.eup %3810  ;;  %v1580_v20 = vmul.f32 1.442695, %v1553_v62  ;;  %v1574_v1 = vmul.f32 1.442695, %v1550_v0 }
 0x4ca   :  { %v4452_v3 = vpop.eup %3812  ;;  %v1535_v5 = vpop.xlane.xlu1 %1534  ;;  %v1605_v9 = vsel %vm279_vm2, %v4450_v31, 0.0 }
 0x4cb   :  { %v1526_v7 = vpop.xlane.xlu0 %1525  ;;  %3822 = vpow2.f32 %v1580_v20  ;;  %v1555_v10 = vsub.f32 %v4385_v54, %v1535_v5  ;;  %1606 = vadd.xlane.f32.xlu1 %v1605_v9  ;;  %v1596_v35 = vsel %vm279_vm2, %v4452_v3, 0.0 }
 0x4cc   :  { %v1552_v42 = vsub.f32 %v4379_v46, %v1526_v7  ;;  %3824 = vpow2.f32 %v1574_v1  ;;  %1597 = vadd.xlane.f32.xlu0 %v1596_v35 }
 0x4cd   :  { %v4460_v17 = vpop.eup %3814  ;;  %v1584_v18 = vmul.f32 1.442695, %v1555_v10 }
 0x4ce   :  { %v1578_v19 = vmul.f32 1.442695, %v1552_v42  ;;  %v4462_v25 = vpop.eup %3816  ;;  %v1541_v29 = vpop.xlane.xlu1 %1540  ;;  %v1611_v30 = vsel %vm279_vm2, %v4460_v17, 0.0 }
 0x4cf   :  { %v1532_v47 = vpop.xlane.xlu0 %1531  ;;  %3826 = vpow2.f32 %v1584_v18  ;;  %v1557_v46 = vsub.f32 %v4393_v2, %v1541_v29  ;;  %1612 = vadd.xlane.f32.xlu1 %v1611_v30  ;;  %v1602_v32 = vsel %vm279_vm2, %v4462_v25, 0.0 }
 0x4d0   :  { %v1554_v54 = vsub.f32 %v4387_v58, %v1532_v47  ;;  %3828 = vpow2.f32 %v1578_v19  ;;  %1603 = vadd.xlane.f32.xlu0 %v1602_v32 }
 0x4d1   :  { %v4470_v33 = vpop.eup %3818  ;;  %v1588_v37 = vmul.f32 1.442695, %v1557_v46 }
 0x4d2   :  { %v1582_v34 = vmul.f32 1.442695, %v1554_v54  ;;  %v4472_v36 = vpop.eup %3820  ;;  %v1617_v39 = vsel %vm279_vm2, %v4470_v33, 0.0 }
 0x4d3   :  { %v1538_v38 = vpop.xlane.xlu0 %1537  ;;  %1618 = vadd.xlane.f32.xlu1 %v1617_v39  ;;  %v1608_v58 = vsel %vm279_vm2, %v4472_v36, 0.0 }
 0x4d4   :  { %v1556_v2 = vsub.f32 %v4395_v6, %v1538_v38  ;;  %3830 = vpow2.f32 %v1582_v34  ;;  %1609 = vadd.xlane.f32.xlu0 %v1608_v58 }
 0x4d5   :  { %v4479_v40 = vpop.eup %3822  ;;  %3832 = vpow2.f32 %v1588_v37 }
 0x4d6   :  { %v1586_v43 = vmul.f32 1.442695, %v1556_v2  ;;  %v4481_v44 = vpop.eup %3824  ;;  %v1623_v45 = vsel %vm279_vm2, %v4479_v40, 0.0 }
 0x4d7   :  { %1624 = vadd.xlane.f32.xlu1 %v1623_v45  ;;  %v1614_v6 = vsel %vm279_vm2, %v4481_v44, 0.0  ;;  %v4511_v56 = vpop.permute.xlu0 %2430 }
 0x4d8   :  { %3834 = vpow2.f32 %v1586_v43  ;;  %1615 = vadd.xlane.f32.xlu0 %v1614_v6 }
 0x4d9   :  { %v4487_v52 = vpop.eup %3826 }
 0x4da   :  { %v4489_v48 = vpop.eup %3828  ;;  %v1629_v59 = vsel %vm279_vm2, %v4487_v52, 0.0 }
 0x4db   :  { %1630 = vadd.xlane.f32.xlu1 %v1629_v59  ;;  %v1620_v50 = vsel %vm279_vm2, %v4489_v48, 0.0  ;;  %v4513_v57 = vpop.permute.xlu0 %2582 }
 0x4dc   :  { %1621 = vadd.xlane.f32.xlu0 %v1620_v50 }
 0x4de   :  { %v4495_v51 = vpop.eup %3830 }
 0x4df   :  { %v1626_v53 = vsel %vm279_vm2, %v4495_v51, 0.0  ;;  %v4499_v4 = vpop.eup %3832 }
 0x4e0   :  { %1627 = vadd.xlane.f32.xlu0 %v1626_v53  ;;  %v1635_v8 = vsel %vm279_vm2, %v4499_v4, 0.0 }
 0x4e2   :  { %v4501_v63 = vpop.eup %3834 }
 0x4e3   :  { %v1632_v55 = vsel %vm279_vm2, %v4501_v63, 0.0 }
 0x4e4   :  { %1633 = vadd.xlane.f32.xlu1 %v1632_v55  ;;  %1636 = vadd.xlane.f32.xlu0 %v1635_v8 }
 0x4f5   :  { %2810 = vrot.lane.b32.xlu1 %v4232_v26, %s4020_s1  ;;  %v4521_v26 = vpop.permute.xlu1 %2506 }
 0x4fa   :  { %2734 = vrot.lane.b32.xlu0 %v4211_v23, %s4020_s1  ;;  %v4523_v23 = vpop.permute.xlu1 %2658  ;;  %s4029_s1 = smov 16  }
 0x50b   :  { %v1592_v60 = vpop.xlane.xlu0 %1591 }
 0x50c   :  { %3836 = vrcp.f32 %v1592_v60 }
 0x516   :  { %v3837_v61 = vpop.eup %3836 }
 0x517   :  { %v1654_v62 = vmul.f32 %v3837_v61, %v4418_v21 }
 0x519   :  { %3634 = vmatmul.mubr.msk.f32.vlgmr.msra.gmra.mrb[16].mxu1 %vm279_vm2, %v1654_v62 }
 0x51a   :  { %3642 = vmatpush3.msra.mxu1 %v4405_v12  ;;  %3643 = vmatprep.mubr.msk.f32.mxu1 %vm4027_vm1, %v4026_v11 }
 0x51b   :  { %3651 = vmatprep.subr.mxu1 %v4026_v11 }
 0x550   :  { %v1595_v0 = vpop.xlane.xlu1 %1594 }
 0x551   :  { %3838 = vrcp.f32 %v1595_v0 }
 0x554   :  { %v1601_v20 = vpop.xlane.xlu1 %1600 }
 0x555   :  { %3840 = vrcp.f32 %v1601_v20 }
 0x558   :  { %v1607_v1 = vpop.xlane.xlu1 %1606 }
 0x559   :  { %3842 = vrcp.f32 %v1607_v1  ;;  %v1598_v21 = vpop.xlane.xlu0 %1597 }
 0x55a   :  { %3844 = vrcp.f32 %v1598_v21 }
 0x55b   :  { %v3839_v5 = vpop.eup %3838 }
 0x55c   :  { %v1655_v12 = vmul.f32 %v3839_v5, %v4438_v49  ;;  %v1613_v7 = vpop.xlane.xlu1 %1612 }
 0x55d   :  { %3846 = vrcp.f32 %v1613_v7  ;;  %v1604_v9 = vpop.xlane.xlu0 %1603 }
 0x55e   :  { %3848 = vrcp.f32 %v1604_v9  ;;  %3639 = vmatmul.mubr.msk.f32.vlgmr.msra.gmra.mrb[20].mxu0 %vm279_vm2, %v1655_v12 }
 0x55f   :  { %v3841_v10 = vpop.eup %3840  ;;  %3647 = vmatpush3.msra.mxu0 %v4422_v24  ;;  %3648 = vmatprep.mubr.msk.f32.mxu0 %vm4027_vm1, %v4026_v11 }
 0x560   :  { %v1657_v42 = vmul.f32 %v3841_v10, %v4444_v16  ;;  %v1619_v35 = vpop.xlane.xlu1 %1618  ;;  %3656 = vmatprep.subr.mxu0 %v4026_v11 }
 0x561   :  { %3850 = vrcp.f32 %v1619_v35  ;;  %v1610_v18 = vpop.xlane.xlu0 %1609 }
 0x562   :  { %3852 = vrcp.f32 %v1610_v18  ;;  %3649 = vmatmul.mubr.msk.f32.vlgmr.msra.gmra.mrb[22].mxu0 %vm279_vm2, %v1657_v42  ;;  %v3788_v42 = vld [vmem:[#allocation7] sm:$0xff]  }
 0x563   :  { %v3843_v49 = vpop.eup %3842  ;;  %3657 = vmatpush3.msra.mxu0 %v4428_v13  ;;  %3658 = vmatprep.mubr.msk.f32.mxu0 %vm4027_vm1, %v4026_v11 }
 0x564   :  { %v3845_v24 = vpop.eup %3844  ;;  %v1659_v19 = vmul.f32 %v3843_v49, %v4450_v31  ;;  %v1625_v29 = vpop.xlane.xlu1 %1624  ;;  %3666 = vmatprep.subr.mxu0 %v4026_v11 }
 0x565   :  { %v1656_v16 = vmul.f32 %v3845_v24, %v4452_v3  ;;  %3854 = vrcp.f32 %v1625_v29  ;;  %v1616_v47 = vpop.xlane.xlu0 %1615  ;;  %v3789_v29 = vld [vmem:[#allocation7 + $0x8] sm:$0xff]  }
 0x566   :  { %3856 = vrcp.f32 %v1616_v47  ;;  %3659 = vmatmul.mubr.msk.f32.vlgmr.msra.gmra.mrb[24].mxu0 %vm279_vm2, %v1659_v19 }
 0x567   :  { %v3847_v30 = vpop.eup %3846  ;;  %3644 = vmatmul.mubr.msk.f32.vlgmr.msra.gmra.mrb[18].mxu1 %vm279_vm2, %v1656_v16  ;;  %3667 = vmatpush3.msra.mxu0 %v4430_v28 }
 0x568   :  { %v3849_v13 = vpop.eup %3848  ;;  %v1661_v46 = vmul.f32 %v3847_v30, %v4460_v17  ;;  %3652 = vmatpush3.msra.mxu1 %v4424_v27  ;;  %v1631_v31 = vpop.xlane.xlu1 %1630  ;;  %3653 = vmatprep.mubr.msk.f32.mxu1 %vm4027_vm1, %v4026_v11 }
 0x569   :  { %v1658_v3 = vmul.f32 %v3849_v13, %v4462_v25  ;;  %3858 = vrcp.f32 %v1631_v31  ;;  %v1622_v54 = vpop.xlane.xlu0 %1621  ;;  %3661 = vmatprep.subr.mxu1 %v4026_v11  ;;  %3668 = vmatprep.mubr.msk.f32.mxu0 %vm4027_vm1, %v4026_v11 }
 0x56a   :  { %3860 = vrcp.f32 %v1622_v54  ;;  %3676 = vmatprep.subr.mxu0 %v4026_v11  ;;  %3669 = vmatmul.mubr.msk.f32.vlgmr.msra.gmra.mrb[26].mxu0 %vm279_vm2, %v1661_v46 }
 0x56b   :  { %v3851_v28 = vpop.eup %3850  ;;  %3654 = vmatmul.mubr.msk.f32.vlgmr.msra.gmra.mrb[20].mxu1 %vm279_vm2, %v1658_v3  ;;  %3677 = vmatpush3.msra.mxu0 %v4426_v22 }
 0x56c   :  { %v3853_v27 = vpop.eup %3852  ;;  %v1663_v17 = vmul.f32 %v3851_v28, %v4470_v33  ;;  %3662 = vmatpush3.msra.mxu1 %v4415_v15  ;;  %3663 = vmatprep.mubr.msk.f32.mxu1 %vm4027_vm1, %v4026_v11 }
 0x56d   :  { %v1660_v25 = vmul.f32 %v3853_v27, %v4472_v36  ;;  %v1628_v32 = vpop.xlane.xlu0 %1627  ;;  %3671 = vmatprep.subr.mxu1 %v4026_v11  ;;  %3678 = vmatprep.mubr.msk.f32.mxu0 %vm4027_vm1, %v4026_v11 }
 0x56e   :  { %3862 = vrcp.f32 %v1628_v32  ;;  %3686 = vmatprep.subr.mxu0 %v4026_v11  ;;  %3679 = vmatmul.mubr.msk.f32.vlgmr.msra.gmra.mrb[28].mxu0 %vm279_vm2, %v1663_v17 }
 0x56f   :  { %v3855_v22 = vpop.eup %3854  ;;  %3664 = vmatmul.mubr.msk.f32.vlgmr.msra.gmra.mrb[22].mxu1 %vm279_vm2, %v1660_v25  ;;  %3687 = vmatpush3.msra.mxu0 %v4521_v26 }
 0x570   :  { %v3857_v15 = vpop.eup %3856  ;;  %v1665_v33 = vmul.f32 %v3855_v22, %v4479_v40  ;;  %3672 = vmatpush3.msra.mxu1 %v4409_v14  ;;  %3673 = vmatprep.mubr.msk.f32.mxu1 %vm4027_vm1, %v4026_v11 }
 0x571   :  { %v1634_v34 = vpop.xlane.xlu1 %1633  ;;  %v1662_v36 = vmul.f32 %v3857_v15, %v4481_v44  ;;  %v1637_v37 = vpop.xlane.xlu0 %1636  ;;  %3681 = vmatprep.subr.mxu1 %v4026_v11  ;;  %3688 = vmatprep.mubr.msk.f32.mxu0 %vm4027_vm1, %v4026_v11 }
 0x572   :  { %3864 = vrcp.f32 %v1634_v34  ;;  %3696 = vmatprep.subr.mxu0 %v4026_v11  ;;  %3689 = vmatmul.mubr.msk.f32.vlgmr.msra.gmra.mrb[30].mxu0 %vm279_vm2, %v1665_v33 }
 0x573   :  { %3866 = vrcp.f32 %v1637_v37  ;;  %v3859_v38 = vpop.eup %3858  ;;  %3674 = vmatmul.mubr.msk.f32.vlgmr.msra.gmra.mrb[24].mxu1 %vm279_vm2, %v1662_v36  ;;  %3697 = vmatpush3.msra.mxu0 %v4523_v23 }
 0x574   :  { %v3861_v14 = vpop.eup %3860  ;;  %v1667_v39 = vmul.f32 %v3859_v38, %v4487_v52  ;;  %3682 = vmatpush3.msra.mxu1 %v4511_v56  ;;  %3683 = vmatprep.mubr.msk.f32.mxu1 %vm4027_vm1, %v4026_v11 }
 0x575   :  { %v2811_v2 = vpop.permute.xlu1 %2810  ;;  %v1664_v58 = vmul.f32 %v3861_v14, %v4489_v48  ;;  %3691 = vmatprep.subr.mxu1 %v4026_v11  ;;  %3698 = vmatprep.mubr.msk.f32.mxu0 %vm4027_vm1, %v4026_v11  ;;  %v2735_v45 = vpop.permute.xlu0 %2734 }
 0x576   :  { %3706 = vmatprep.subr.mxu0 %v4026_v11  ;;  %3699 = vmatmul.mubr.msk.f32.vlgmr.msra.gmra.mrb[32].mxu0 %vm279_vm2, %v1667_v39 }
 0x577   :  { %3684 = vmatmul.mubr.msk.f32.vlgmr.msra.gmra.mrb[26].mxu1 %vm279_vm2, %v1664_v58  ;;  %3707 = vmatpush3.msra.mxu0 %v2811_v2 }
 0x578   :  { %v3863_v40 = vpop.eup %3862  ;;  %3692 = vmatpush3.msra.mxu1 %v4513_v57  ;;  %3693 = vmatprep.mubr.msk.f32.mxu1 %vm4027_vm1, %v4026_v11 }
 0x579   :  { %v1666_v43 = vmul.f32 %v3863_v40, %v4495_v51  ;;  %3701 = vmatprep.subr.mxu1 %v4026_v11  ;;  %3708 = vmatprep.mubr.msk.f32.mxu0 %vm4027_vm1, %v4026_v11 }
 0x57b   :  { %3694 = vmatmul.mubr.msk.f32.vlgmr.msra.gmra.mrb[28].mxu1 %vm279_vm2, %v1666_v43 }
 0x57c   :  { %v3865_v44 = vpop.eup %3864  ;;  %3702 = vmatpush3.msra.mxu1 %v2735_v45  ;;  %3703 = vmatprep.mubr.msk.f32.mxu1 %vm4027_vm1, %v4026_v11 }
 0x57d   :  { %v3867_v6 = vpop.eup %3866  ;;  %v1668_v52 = vmul.f32 %v3865_v44, %v4501_v63  ;;  %3711 = vmatprep.subr.bf16.mxu1 %v3788_v42 }
 0x57e   :  { %v1669_v48 = vmul.f32 %v3867_v6, %v4499_v4 }
 0x57f   :  { %3704 = vmatmul.mubr.msk.f32.vlgmr.msra.gmra.mrb[30].mxu1 %vm279_vm2, %v1668_v52 }
 0x580   :  { %3709 = vmatmul.mubr.msk.f32.vlgmr.msra.gmra.mrb[34].mxu0 %vm279_vm2, %v1669_v48  ;;  %3712 = vmatpush3.bf16.msra.mxu1 %v3788_v42 }
 0x581   :  { %3713 = vmatprep.subr.bf16.mxu1 %v3789_v29 }
 0x584   :  { %3714 = vmatpush3.bf16.msra.mxu1 %v3789_v29 }
 0x5ec   :  { %v4603_v59 = vpop.f32.mrb[16].mxu1 }
 0x5ed   :  { %v3635_v50 = vpop.f32.mrb[17].mxu1 }
 0x631   :  { %v1818_v51 = vpop.f32.mrb[20].mxu0 }
 0x632   :  { %v3640_v53 = vpop.f32.mrb[21].mxu0 }
 0x635   :  { %v1970_v55 = vpop.f32.mrb[22].mxu0 }
 0x636   :  { %v3650_v8 = vpop.f32.mrb[23].mxu0 }
 0x639   :  { %v2122_v56 = vpop.f32.mrb[24].mxu0 }
 0x63a   :  { %v1894_v57 = vpop.f32.mrb[18].mxu1  ;;  %v3756_v63 = vpack.i.bf16 %v2122_v56, %v1818_v51  ;;  %v3660_v60 = vpop.f32.mrb[25].mxu0 }
 0x63b   :  { %v3645_v61 = vpop.f32.mrb[19].mxu1  ;;  %v2956_v60 = vsub.s32 3, %v4160_v41 }
 0x63c   :  { %3757 = vrot.lane.b32.xlu0 %v3756_v63, %s4018_s23  ;;  %v4623_v61 = vld [vmem:[#allocation5] sm:$0xff] }
 0x63d   :  { %v2274_v11 = vpop.f32.mrb[26].mxu0 }
 0x63e   :  { %v2046_v4 = vpop.f32.mrb[20].mxu1  ;;  %v3766_v62 = vpack.i.bf16 %v2274_v11, %v1970_v55  ;;  %v3670_v26 = vpop.f32.mrb[27].mxu0  ;;  %v2957_v11 = vrot.slane %v4623_v61, %v2956_v60 }
 0x63f   :  { %v3655_v23 = vpop.f32.mrb[21].mxu1 }
 0x641   :  { %v2426_v0 = vpop.f32.mrb[28].mxu0 }
 0x642   :  { %v2198_v20 = vpop.f32.mrb[22].mxu1  ;;  %v3680_v1 = vpop.f32.mrb[29].mxu0 }
 0x643   :  { %v3761_v21 = vpack.i.bf16 %v2198_v20, %v1894_v57  ;;  %v3665_v5 = vpop.f32.mrb[23].mxu1  ;;  %v3893_v1 = vld [vmem:[%s4739_s0] sm:$0xff] }
 0x645   :  { %3762 = vrot.lane.b32.xlu0 %v3761_v21, %s4029_s1  ;;  %v2578_v12 = vpop.f32.mrb[30].mxu0 }
 0x646   :  { %v2350_v7 = vpop.f32.mrb[24].mxu1  ;;  %v3690_v9 = vpop.f32.mrb[31].mxu0 }
 0x647   :  { %v3675_v10 = vpop.f32.mrb[25].mxu1 }
 0x648   :  { %v3895_v10 = vld [vmem:[%s4739_s0 + $0x8] sm:$0xff] }
 0x649   :  { %3767 = vrot.lane.b32.xlu0 %v3766_v62, %s4030_s19  ;;  %v2730_v35 = vpop.f32.mrb[32].mxu0 }
 0x64a   :  { %v2502_v18 = vpop.f32.mrb[26].mxu1  ;;  %v3771_v49 = vpack.i.bf16 %v2730_v35, %v2426_v0  ;;  %v3700_v24 = vpop.f32.mrb[33].mxu0 }
 0x64b   :  { %v3685_v19 = vpop.f32.mrb[27].mxu1 }
 0x64c   :  { %3772 = vrot.lane.b32.xlu1 %v3771_v49, %s4018_s23  ;;  %v3896_v49 = vld [vmem:[%s4739_s0 + $0x18] sm:$0xff] }
 0x64e   :  { %v2654_v16 = vpop.f32.mrb[28].mxu1 }
 0x64f   :  { %v3695_v47 = vpop.f32.mrb[29].mxu1 }
 0x652   :  { %v2806_v30 = vpop.f32.mrb[30].mxu1 }
 0x653   :  { %v2882_v13 = vpop.f32.mrb[34].mxu0  ;;  %v3776_v46 = vpack.i.bf16 %v2806_v30, %v2502_v18  ;;  %v3705_v3 = vpop.f32.mrb[31].mxu1 }
 0x654   :  { %v3781_v31 = vpack.i.bf16 %v2882_v13, %v2578_v12  ;;  %v3710_v54 = vpop.f32.mrb[35].mxu0  ;;  %v3894_v12 = vld [vmem:[%s4739_s0 + $0x10] sm:$0xff] }
 0x655   :  { %3777 = vrot.lane.b32.xlu1 %v3776_v46, %s4029_s1 }
 0x659   :  { %3782 = vrot.lane.b32.xlu1 %v3781_v31, %s4030_s19 }
 0x6ae   :  { %v3758_v28 = vpop.permute.xlu0 %3757 }
 0x6af   :  { %v3760_v17 = vunpack.i.h.bf16 %v3758_v28  ;;  %v3759_v25 = vunpack.i.l.bf16 %v3758_v28 }
 0x6b1   :  { %v2935_v33 = vsel %vm279_vm2, %v2046_v4, %v3760_v17  ;;  %v2934_v34 = vsel %vm279_vm2, %v4603_v59, %v3759_v25 }
 0x6b7   :  { %v3763_v27 = vpop.permute.xlu0 %3762 }
 0x6b8   :  { %v3765_v32 = vunpack.i.h.bf16 %v3763_v27  ;;  %v3764_v22 = vunpack.i.l.bf16 %v3763_v27 }
 0x6ba   :  { %v2939_v38 = vsel %vm2938_vm3, %v2934_v34, %v3764_v22  ;;  %v2940_v14 = vsel %vm2938_vm3, %v2935_v33, %v3765_v32 }
 0x6bb   :  { %v3768_v15 = vpop.permute.xlu0 %3767 }
 0x6bc   :  { %v3770_v36 = vunpack.i.h.bf16 %v3768_v15  ;;  %v3769_v37 = vunpack.i.l.bf16 %v3768_v15 }
 0x6be   :  { %v2944_v39 = vsel %vm2943_vm4, %v2939_v38, %v3769_v37  ;;  %v2945_v2 = vsel %vm2943_vm4, %v2940_v14, %v3770_v36  ;;  %v3773_v40 = vpop.permute.xlu1 %3772  ;;  %v3790_v14 = vld [vmem:[#allocation8] sm:$0xff]  }
 0x6bf   :  { %v2948_v58 = vpack.c.bf16 %v2945_v2, %v2944_v39  ;;  %v3775_v44 = vunpack.i.h.bf16 %v3773_v40  ;;  %v3774_v45 = vunpack.i.l.bf16 %v3773_v40  ;;  %3719 = vmatprep.subr.bf16.mxu0 %v3790_v14  ;;  %v3791_v39 = vld [vmem:[#allocation8 + $0x8] sm:$0xff]  }
 0x6c0   :  { %3720 = vmatpush3.bf16.msra.mxu0 %v3790_v14 }
 0x6c1   :  { %3715 = vmatprep.mubr.msk.bf16.mxu1 %vm86_vm0, %v2948_v58  ;;  %v2936_v59 = vsel %vm279_vm2, %v2350_v7, %v3774_v45  ;;  %v2937_v50 = vsel %vm279_vm2, %v2654_v16, %v3775_v44  ;;  %3721 = vmatprep.subr.bf16.mxu0 %v3791_v39 }
 0x6c4   :  { %3722 = vmatpush3.bf16.msra.mxu0 %v3791_v39 }
 0x6c7   :  { %v3778_v43 = vpop.permute.xlu1 %3777 }
 0x6c8   :  { %v3780_v6 = vunpack.i.h.bf16 %v3778_v43  ;;  %v3779_v52 = vunpack.i.l.bf16 %v3778_v43 }
 0x6ca   :  { %v2942_v55 = vsel %vm2938_vm3, %v2937_v50, %v3780_v6  ;;  %v2941_v8 = vsel %vm2938_vm3, %v2936_v59, %v3779_v52 }
 0x6cb   :  { %v3783_v48 = vpop.permute.xlu1 %3782 }
 0x6cc   :  { %v3785_v51 = vunpack.i.h.bf16 %v3783_v48  ;;  %v3784_v53 = vunpack.i.l.bf16 %v3783_v48 }
 0x6ce   :  { %v2946_v56 = vsel %vm2943_vm4, %v2941_v8, %v3784_v53  ;;  %v2947_v57 = vsel %vm2943_vm4, %v2942_v55, %v3785_v51  ;;  %v3083_v51 = vsub.s32 4, %v4160_v41  ;;  %v3091_v8 = vsub.s32 5, %v4160_v41 }
 0x6cf   :  { %v2949_v63 = vpack.c.bf16 %v2947_v57, %v2946_v56 }
 0x6d0   :  { %v3084_v55 = vrot.slane %v4623_v61, %v3083_v51 }
 0x6d1   :  { %3716 = vmatmul.mubr.msk.bf16.vlgmr.msra.gmra.mrb[32].mxu1 %vm86_vm0, %v2949_v63 }
 0x7a4   :  { %v3717_v4 = vpop.f32.mrb[32].mxu1 }
 0x7a5   :  { %v3010_v62 = vpop.f32.mrb[33].mxu1  ;;  %v3019_v26 = vadd.f32 %v3717_v4, %v2957_v11  ;;  %v3092_v4 = vrot.slane %v4623_v61, %v3091_v8 }
 0x7a6   :  { %v3011_v23 = vadd.f32 %v3010_v62, %v2957_v11  ;;  %v3718_v0 = vpop.f32.mrb[34].mxu1 }
 0x7a7   :  { %v3013_v20 = vpop.f32.mrb[35].mxu1  ;;  %v4634_v7 = vadd.f32 %v3894_v12, %v3019_v26  ;;  %v3022_v9 = vadd.f32 %v3718_v0, %v2957_v11 }
 0x7a8   :  { %v4629_v21 = vadd.f32 %v3893_v1, %v3011_v23  ;;  %v3014_v5 = vadd.f32 %v3013_v20, %v2957_v11 }
 0x7a9   :  { %v4648_v24 = vadd.f32 %v3896_v49, %v3022_v9  ;;  %v3035_v19 = vsel %vm86_vm0, %v4634_v7, 0.0 }
 0x7aa   :  { %v4639_v42 = vadd.f32 %v3895_v10, %v3014_v5  ;;  %v3029_v35 = vsel %vm86_vm0, %v4629_v21, 0.0 }
 0x7ab   :  { %3030 = vadd.xlane.f32.xlu0 %v3029_v35  ;;  %v3038_v29 = vsel %vm86_vm0, %v4648_v24, 0.0 }
 0x7ac   :  { %v3032_v18 = vsel %vm86_vm0, %v4639_v42, 0.0 }
 0x7ad   :  { %3033 = vadd.xlane.f32.xlu1 %v3032_v18 }
 0x7af   :  { %3036 = vadd.xlane.f32.xlu0 %v3035_v19  ;;  %v3792_v19 = vld [vmem:[%s4745_s6] sm:$0xff]  }
 0x7b0   :  { %3727 = vmatprep.subr.bf16.mxu1 %v3792_v19 }
 0x7b1   :  { %3728 = vmatpush3.bf16.msra.mxu1 %v3792_v19 }
 0x7b3   :  { %3039 = vadd.xlane.f32.xlu0 %v3038_v29  ;;  %v3793_v29 = vld [vmem:[%s4745_s6 + $0x8] sm:$0xff]  }
 0x7b4   :  { %3729 = vmatprep.subr.bf16.mxu1 %v3793_v29 }
 0x7b5   :  { %3730 = vmatpush3.bf16.msra.mxu1 %v3793_v29 }
 0x838   :  { %v3031_v16 = vpop.xlane.xlu0 %3030 }
 0x839   :  { %v3041_v47 = vmul.f32 0.03125, %v3031_v16  ;;  %v3794_v16 = vld [vmem:[%s4745_s6 + $0x10] sm:$0xff]  }
 0x83a   :  { %v3034_v30 = vpop.xlane.xlu1 %3033  ;;  %3731 = vmatprep.subr.bf16.mxu1 %v3794_v16 }
 0x83b   :  { %v3045_v13 = vsub.f32 %v4629_v21, %v3041_v47  ;;  %v3042_v46 = vmul.f32 0.03125, %v3034_v30  ;;  %3732 = vmatpush3.bf16.msra.mxu1 %v3794_v16  ;;  %v3795_v47 = vld [vmem:[%s4745_s6 + $0x18] sm:$0xff]   ;;  %v3105_v30 = vsub.s32 6, %v4160_v41  ;;  %s4031_s6 = smov [#allocation10]  }
 0x83c   :  { %v3037_v31 = vpop.xlane.xlu0 %3036  ;;  %3733 = vmatprep.subr.bf16.mxu1 %v3795_v47  ;;  %s3381_s12 = sshll.u32 %s4031_s6, 4  ;;  %s3382_s12 = int_to_ptr.vmem [resolvable:$true] %s3381_s12 }
 0x83d   :  { %v3046_v3 = vsub.f32 %v4639_v42, %v3042_v46  ;;  %v3043_v54 = vmul.f32 0.03125, %v3037_v31  ;;  %v3049_v28 = vmul.f32 %v3045_v13, %v3045_v13  ;;  %s3985_s13 = scalar_lea.vmem %s3382_s12, 512  ;;  %p3990_p5 = scmp.lt.s32.totalorder %s3382_s12, %s3382_s12 }
 0x83e   :  { %p3986_p4 = scmp.ne.s32.totalorder %s3382_s12, %s3985_s13  ;;  %p3991_p6 = scmp.lt.s32.totalorder %s3985_s13, %s3985_s13 }
 0x83f   :  { %v3047_v27 = vsub.f32 %v4634_v7, %v3043_v54  ;;  %v3053_v17 = vsel %vm86_vm0, %v3049_v28, 0.0  ;;  %v3050_v25 = vmul.f32 %v3046_v3, %v3046_v3  ;;  %3734 = vmatpush3.bf16.msra.mxu1 %v3795_v47 }
 0x840   :  { %3054 = vadd.xlane.f32.xlu0 %v3053_v17  ;;  %v3040_v32 = vpop.xlane.xlu0 %3039  ;;  %p3992_p7 = por %p3991_p6, %p3990_p5 }
 0x841   :  { %v3044_v22 = vmul.f32 0.03125, %v3040_v32  ;;  %v3056_v15 = vsel %vm86_vm0, %v3050_v25, 0.0  ;;  %v3051_v33 = vmul.f32 %v3047_v27, %v3047_v27 }
 0x842   :  { %3057 = vadd.xlane.f32.xlu1 %v3056_v15  ;;  %p3993_p8 = pnand %p3992_p7, %p3986_p4 }
 0x843   :  { %v3048_v34 = vsub.f32 %v4648_v24, %v3044_v22  ;;  %v3059_v36 = vsel %vm86_vm0, %v3051_v33, 0.0 }
 0x844   :  { %3060 = vadd.xlane.f32.xlu0 %v3059_v36 }
 0x845   :  { %v3052_v37 = vmul.f32 %v3048_v34, %v3048_v34 }
 0x847   :  { %v3062_v38 = vsel %vm86_vm0, %v3052_v37, 0.0 }
 0x848   :  { %3063 = vadd.xlane.f32.xlu1 %v3062_v38 }
 0x8cd   :  { %v3055_v2 = vpop.xlane.xlu0 %3054 }
 0x8ce   :  { %v3065_v58 = vmul.f32 0.03125, %v3055_v2 }
 0x8cf   :  { %v3058_v40 = vpop.xlane.xlu1 %3057 }
 0x8d0   :  { %v3069_v43 = vadd.f32 1e-05, %v3065_v58  ;;  %v3066_v44 = vmul.f32 0.03125, %v3058_v40 }
 0x8d1   :  { %v3061_v45 = vpop.xlane.xlu0 %3060 }
 0x8d2   :  { %3868 = vrsqrt.f32 %v3069_v43  ;;  %v3070_v6 = vadd.f32 1e-05, %v3066_v44  ;;  %v3067_v52 = vmul.f32 0.03125, %v3061_v45 }
 0x8d4   :  { %3870 = vrsqrt.f32 %v3070_v6  ;;  %v3071_v48 = vadd.f32 1e-05, %v3067_v52 }
 0x8d5   :  { %v3064_v59 = vpop.xlane.xlu1 %3063 }
 0x8d6   :  { %3872 = vrsqrt.f32 %v3071_v48  ;;  %v3068_v50 = vmul.f32 0.03125, %v3064_v59 }
 0x8d8   :  { %v3072_v53 = vadd.f32 1e-05, %v3068_v50 }
 0x8da   :  { %3874 = vrsqrt.f32 %v3072_v53 }
 0x8dc   :  { %v3869_v56 = vpop.eup %3868 }
 0x8dd   :  { %v3077_v57 = vmul.f32 %v3869_v56, %v3045_v13  ;;  %v3106_v13 = vrot.slane %v4623_v61, %v3105_v30 }
 0x8de   :  { %v3871_v63 = vpop.eup %3870 }
 0x8df   :  { %v3078_v60 = vmul.f32 %v3871_v63, %v3046_v3  ;;  %v3085_v11 = vmul.f32 %v3084_v55, %v3077_v57 }
 0x8e0   :  { %v3873_v62 = vpop.eup %3872 }
 0x8e1   :  { %v3079_v26 = vmul.f32 %v3873_v62, %v3047_v27  ;;  %v3086_v23 = vmul.f32 %v3084_v55, %v3078_v60  ;;  %v3093_v0 = vadd.f32 %v3092_v4, %v3085_v11 }
 0x8e3   :  { %v3094_v20 = vadd.f32 %v3092_v4, %v3086_v23  ;;  %v3087_v5 = vmul.f32 %v3084_v55, %v3079_v26 }
 0x8e4   :  { %v3875_v1 = vpop.eup %3874 }
 0x8e5   :  { %v3080_v12 = vmul.f32 %v3875_v1, %v3048_v34  ;;  %v3097_v9 = vpack.c.bf16 %v3094_v20, %v3093_v0  ;;  %v3095_v35 = vadd.f32 %v3092_v4, %v3087_v5 }
 0x8e7   :  { %v3088_v10 = vmul.f32 %v3084_v55, %v3080_v12  ;;  %3723 = vmatprep.mubr.msk.bf16.mxu0 %vm86_vm0, %v3097_v9 }
 0x8e9   :  { %v3096_v18 = vadd.f32 %v3092_v4, %v3088_v10 }
 0x8eb   :  { %v3098_v49 = vpack.c.bf16 %v3096_v18, %v3095_v35 }
 0x8ed   :  { %3724 = vmatmul.mubr.msk.bf16.vlgmr.msra.gmra.mrb[36].mxu0 %vm86_vm0, %v3098_v49 }
 0x9c0   :  { %v3725_v46 = vpop.f32.mrb[36].mxu0 }
 0x9c1   :  { %v4682_v31 = vadd.f32 %v3725_v46, %v3106_v13  ;;  %v3159_v3 = vpop.f32.mrb[37].mxu0 }
 0x9c2   :  { %v4684_v54 = vadd.f32 %v3159_v3, %v3106_v13  ;;  %v3726_v28 = vpop.f32.mrb[38].mxu0 }
 0x9c3   :  { %v4687_v27 = vmul.f32 0.70710677, %v4682_v31  ;;  %v4689_v17 = vadd.f32 %v3726_v28, %v3106_v13  ;;  %v3162_v25 = vpop.f32.mrb[39].mxu0 }
 0x9c4   :  { %v4692_v32 = vmul.f32 0.70710677, %v4684_v54  ;;  %v4694_v22 = vadd.f32 %v3162_v25, %v3106_v13 }
 0x9c5   :  { %v3180_v15 = vand.u32 2147483647, %v4687_v27  ;;  %v4698_v33 = vmul.f32 0.70710677, %v4689_v17  ;;  %vm3256_vm5 = vcmp.ge.f32.partialorder %v4687_v27, 0.0 }
 0x9c6   :  { %v3178_v34 = vand.u32 2147483647, %v4692_v32  ;;  %v4702_v36 = vmul.f32 0.70710677, %v4694_v22  ;;  %vm3254_vm6 = vcmp.ge.f32.partialorder %v4692_v32, 0.0  ;;  %v3286_v32 = vsub.s32 7, %v4160_v41 }
 0x9c7   :  { %v3184_v37 = vmul.f32 0.3275911, %v3180_v15  ;;  %v3181_v38 = vand.u32 2147483647, %v4698_v33  ;;  %v3236_v6 = vsub.f32 0.0, %v3180_v15  ;;  %vm3257_vm7 = vcmp.ge.f32.partialorder %v4698_v33, 0.0 }
 0x9c8   :  { %v3182_v14 = vmul.f32 0.3275911, %v3178_v34  ;;  %v3179_v39 = vand.u32 2147483647, %v4702_v36  ;;  %v3234_v52 = vsub.f32 0.0, %v3178_v34  ;;  %vm3255_vm8 = vcmp.ge.f32.partialorder %v4702_v36, 0.0 }
 0x9c9   :  { %v3188_v2 = vadd.f32 1.0, %v3184_v37  ;;  %v3185_v58 = vmul.f32 0.3275911, %v3181_v38  ;;  %v3240_v59 = vmul.f32 %v3236_v6, %v3180_v15  ;;  %v3237_v50 = vsub.f32 0.0, %v3181_v38 }
 0x9ca   :  { %v3186_v40 = vadd.f32 1.0, %v3182_v14  ;;  %v3183_v43 = vmul.f32 0.3275911, %v3179_v39  ;;  %v3238_v55 = vmul.f32 %v3234_v52, %v3178_v34  ;;  %v3235_v56 = vsub.f32 0.0, %v3179_v39 }
 0x9cb   :  { %3876 = vrcp.f32 %v3188_v2  ;;  %v3189_v44 = vadd.f32 1.0, %v3185_v58  ;;  %v3246_v60 = vmul.f32 1.442695, %v3240_v59  ;;  %v3241_v4 = vmul.f32 %v3237_v50, %v3181_v38 }
 0x9cc   :  { %3878 = vrcp.f32 %v3186_v40  ;;  %v3187_v45 = vadd.f32 1.0, %v3183_v43  ;;  %v3242_v26 = vmul.f32 1.442695, %v3238_v55  ;;  %v3239_v1 = vmul.f32 %v3235_v56, %v3179_v39 }
 0x9cd   :  { %3880 = vrcp.f32 %v3189_v44  ;;  %v3248_v35 = vmul.f32 1.442695, %v3241_v4  ;;  %v3287_v33 = vrot.slane %v4623_v61, %v3286_v32 }
 0x9ce   :  { %3882 = vrcp.f32 %v3187_v45  ;;  %v3244_v16 = vmul.f32 1.442695, %v3239_v1 }
 0x9cf   :  { %3884 = vpow2.f32 %v3246_v60 }
 0x9d0   :  { %3886 = vpow2.f32 %v3242_v26 }
 0x9d1   :  { %3888 = vpow2.f32 %v3248_v35 }
 0x9d2   :  { %3890 = vpow2.f32 %v3244_v16 }
 0x9d5   :  { %v3877_v48 = vpop.eup %3876 }
 0x9d6   :  { %v3879_v51 = vpop.eup %3878  ;;  %v3200_v53 = vmul.f32 1.0614054, %v3877_v48 }
 0x9d7   :  { %v3198_v8 = vmul.f32 1.0614054, %v3879_v51  ;;  %v3881_v63 = vpop.eup %3880 }
 0x9d8   :  { %v3204_v57 = vadd.f32 -1.4531521, %v3200_v53  ;;  %v3201_v23 = vmul.f32 1.0614054, %v3881_v63  ;;  %v3883_v0 = vpop.eup %3882 }
 0x9d9   :  { %v3202_v11 = vadd.f32 -1.4531521, %v3198_v8  ;;  %v3199_v9 = vmul.f32 1.0614054, %v3883_v0  ;;  %v3885_v40 = vpop.eup %3884 }
 0x9da   :  { %v3208_v62 = vmul.f32 %v3877_v48, %v3204_v57  ;;  %v3205_v12 = vadd.f32 -1.4531521, %v3201_v23  ;;  %v3887_v44 = vpop.eup %3886 }
 0x9db   :  { %v3206_v20 = vmul.f32 %v3879_v51, %v3202_v11  ;;  %v3203_v19 = vadd.f32 -1.4531521, %v3199_v9  ;;  %v3889_v8 = vpop.eup %3888 }
 0x9dc   :  { %v3212_v5 = vadd.f32 1.4214138, %v3208_v62  ;;  %v3209_v49 = vmul.f32 %v3881_v63, %v3205_v12  ;;  %v3891_v4 = vpop.eup %3890 }
 0x9dd   :  { %v3210_v10 = vadd.f32 1.4214138, %v3206_v20  ;;  %v3207_v13 = vmul.f32 %v3883_v0, %v3203_v19 }
 0x9de   :  { %v3216_v18 = vmul.f32 %v3877_v48, %v3212_v5  ;;  %v3213_v30 = vadd.f32 1.4214138, %v3209_v49 }
 0x9df   :  { %v3214_v29 = vmul.f32 %v3879_v51, %v3210_v10  ;;  %v3211_v25 = vadd.f32 1.4214138, %v3207_v13 }
 0x9e0   :  { %v3220_v47 = vadd.f32 -0.28449672, %v3216_v18  ;;  %v3217_v28 = vmul.f32 %v3881_v63, %v3213_v30 }
 0x9e1   :  { %v3218_v46 = vadd.f32 -0.28449672, %v3214_v29  ;;  %v3215_v38 = vmul.f32 %v3883_v0, %v3211_v25 }
 0x9e2   :  { %v3224_v3 = vmul.f32 %v3877_v48, %v3220_v47  ;;  %v3221_v37 = vadd.f32 -0.28449672, %v3217_v28 }
 0x9e3   :  { %v3222_v15 = vmul.f32 %v3879_v51, %v3218_v46  ;;  %v3219_v58 = vadd.f32 -0.28449672, %v3215_v38 }
 0x9e4   :  { %v3228_v34 = vadd.f32 0.2548296, %v3224_v3  ;;  %v3225_v2 = vmul.f32 %v3881_v63, %v3221_v37 }
 0x9e5   :  { %v3226_v14 = vadd.f32 0.2548296, %v3222_v15  ;;  %v3223_v52 = vmul.f32 %v3883_v0, %v3219_v58 }
 0x9e6   :  { %v3232_v39 = vmul.f32 %v3877_v48, %v3228_v34  ;;  %v3229_v6 = vadd.f32 0.2548296, %v3225_v2 }
 0x9e7   :  { %v3230_v43 = vmul.f32 %v3879_v51, %v3226_v14  ;;  %v3227_v55 = vadd.f32 0.2548296, %v3223_v52 }
 0x9e8   :  { %v3252_v45 = vmul.f32 %v3885_v40, %v3232_v39  ;;  %v3233_v53 = vmul.f32 %v3881_v63, %v3229_v6 }
 0x9e9   :  { %v3250_v59 = vmul.f32 %v3887_v44, %v3230_v43  ;;  %v3231_v11 = vmul.f32 %v3883_v0, %v3227_v55 }
 0x9ea   :  { %v3260_v50 = vmul.f32 0.5, %v3252_v45  ;;  %v3253_v60 = vmul.f32 %v3889_v8, %v3233_v53 }
 0x9eb   :  { %v3258_v56 = vmul.f32 0.5, %v3250_v59  ;;  %v3251_v26 = vmul.f32 %v3891_v4, %v3231_v11 }
 0x9ec   :  { %v3264_v57 = vsub.f32 1.0, %v3260_v50  ;;  %v3261_v48 = vmul.f32 0.5, %v3253_v60 }
 0x9ed   :  { %v3262_v62 = vsub.f32 1.0, %v3258_v56  ;;  %v3259_v20 = vmul.f32 0.5, %v3251_v26 }
 0x9ee   :  { %v3268_v51 = vsel %vm3256_vm5, %v3264_v57, %v3260_v50  ;;  %v3265_v23 = vsub.f32 1.0, %v3261_v48 }
 0x9ef   :  { %v3266_v63 = vsel %vm3254_vm6, %v3262_v62, %v3258_v56  ;;  %v3263_v5 = vsub.f32 1.0, %v3259_v20  ;;  %v3272_v12 = vmul.f32 %v3268_v51, %v4682_v31 }
 0x9f0   :  { %v3269_v1 = vsel %vm3257_vm7, %v3265_v23, %v3261_v48  ;;  %v3270_v10 = vmul.f32 %v3266_v63, %v4684_v54 }
 0x9f1   :  { %v3273_v0 = vmul.f32 %v3269_v1, %v4689_v17  ;;  %v3267_v9 = vsel %vm3255_vm8, %v3263_v5, %v3259_v20 }
 0x9f2   :  { %v3271_v35 = vmul.f32 %v3267_v9, %v4694_v22 }
 0x9f3   :  { %v3275_v27 = vpack.c.bf16 %v3273_v0, %v3272_v12 }
 0x9f4   :  { %v3274_v18 = vpack.c.bf16 %v3271_v35, %v3270_v10 }
 0x9f6   :  { %3735 = vmatprep.mubr.msk.bf16.mxu1 %vm3312_vm9, %v3274_v18 }
 0x9f7   :  { %3736 = vmatmul.mubr.msk.bf16.vlgmr.msra.gmra.mrb[36].mxu1 %vm3312_vm9, %v3275_v27 }
 0xaca   :  { %v3737_v49 = vpop.f32.mrb[36].mxu1 }
 0xacb   :  { %v3362_v31 = vadd.f32 %v3737_v49, %v3287_v33  ;;  %v3353_v19 = vpop.f32.mrb[37].mxu1 }
 0xacc   :  { %v3354_v17 = vadd.f32 %v3353_v19, %v3287_v33  ;;  %v3738_v29 = vpop.f32.mrb[38].mxu1 }
 0xacd   :  { %v3370_v36 = vadd.f32 %v3362_v31, %v4634_v7  ;;  %v3365_v16 = vadd.f32 %v3738_v29, %v3287_v33  ;;  %v3356_v54 = vpop.f32.mrb[39].mxu1 }
 0xace   :  { %v3368_v22 = vadd.f32 %v3354_v17, %v4629_v21  ;;  %v3357_v47 = vadd.f32 %v3356_v54, %v3287_v33 }
 0xacf   :  { %3374 = vst.msk [vmem:[#allocation10 + $0x10] sm:$0xff] %vm86_vm0, %v3370_v36  ;;  %v3371_v41 = vadd.f32 %v3365_v16, %v4648_v24 }
 0xad0   :  { %3372 = vst.msk [vmem:[#allocation10] sm:$0xff] %vm86_vm0, %v3368_v22  ;;  %v3369_v61 = vadd.f32 %v3357_v47, %v4639_v42 }
 0xad1   :  { %3375 = vst.msk [vmem:[#allocation10 + $0x18] sm:$0xff] %vm86_vm0, %v3371_v41 }
 0xad2   :  { %3373 = vst.msk [vmem:[#allocation10 + $0x8] sm:$0xff] %vm86_vm0, %v3369_v61 }
 0xad3   :  { %3996 = shalt.err (!%p3993_p8)
}
 0xad4   :  { %s3997_s15 = scalar_lea.hbm %s4746_s7, 512 }
 0xad5   :  { %p3998_p9 = scmp.ne.s32.totalorder %s4746_s7, %s3997_s15  ;;  %p4001_p10 = scmp.lt.u32.totalorder %s3997_s15, %s4746_s7 }
 0xad7   :  { %p4003_p11 = pnand %p4001_p10, %p3998_p9 }
 0xad9   :  { %4006 = shalt.err (!%p4003_p11)
}
 0xada   :  { %3387 = dma.vmem_to_hbm [thread:$0]  %s3382_s12, 512, %s4746_s7, [#allocation4], %s4017_s2, %s4017_s2, %s4018_s23  }
 0xadb   :  { %4013 = dma.done.wait [#allocation4], 512  }
 0xadc   :  { %4014 = vsyncadd [#allocation4], 4294966784 }
 0xadd   :  { %3391 = vsyncpa [#allocation3], 1 }
 0xade   :  { %3392 = vsyncpa [#allocation6], 1 }
 0xadf   :  { %3393 = vsyncpa [#allocation9], 1 }
 0xae0   :  { %3394 = vsyncpa [#allocation4], 1 }

</bundles_post_ra>
